<compile_context>
chip_gen: v7x
topology: tpu7x:2x2x1
jax: 0.10.0
libtpu: 0.0.40
codegen_flags: <defaults>
</compile_context>

<pallas_src>
import numpy as np
import jax
import jax.numpy as jnp
from jax import lax
from jax.experimental import pallas as pl
from jax.experimental.pallas import tpu as pltpu


def _transformer_kernel(x_ref, w_ref, b_ref, css_ref, cosc_ref, sinc_ref, o_ref):
    """One grid step = one batch element, all L layers run in-registers.

    x_ref   : (S, C)    f32   activation (batch dim squeezed by the BlockSpec)
    w_ref   : (L, C, C) mm-dtype, pre-transposed (kernel computes x @ w)
    b_ref   : (L, 1, C) f32
    css_ref : (2S, S)   dft-dtype, rows = [cosS ; -sinS]  (ortho seq DFT, Re/Im fused)
    cosc_ref: (C, C)    dft-dtype  (ortho chan DFT, cos part)
    sinc_ref: (C, C)    dft-dtype  (ortho chan DFT, sin part)
    o_ref   : (S, C)    f32
    """
    S, C = x_ref.shape
    L = w_ref.shape[0]
    mm_dtype = w_ref.dtype
    dft_dtype = css_ref.dtype

    # Constants hoisted: loaded once per grid step, reused by every layer.
    css = css_ref[...]
    cosc = cosc_ref[...]
    sinc = sinc_ref[...]

    def layer(l, x):
        # ---- ForwardBlock: leaky_relu(x @ W^T + bias + x, 0.2) ----
        h = jnp.dot(x.astype(mm_dtype), w_ref[l],
                    preferred_element_type=jnp.float32)          # MXU, f32 accumulate
        z = h + b_ref[l] + x                                     # bias + residual (VPU, f32)
        z = jnp.where(z >= 0.0, z, jnp.float32(0.2) * z)         # leaky_relu(0.2)

        # ---- FourierMixer: Re(FFT_seq(FFT_chan(z))), ortho ----
        # Seq DFT with Re & Im fused into one MXU issue; Re/Im halves are sublane-
        # aligned slices (free vreg selection for S % 8 == 0) -- no relayouts.
        u = jnp.dot(css, z.astype(dft_dtype),
                    preferred_element_type=jnp.float32)          # (2S, C)
        ur = u[:S]                                               # Re =  cosS @ z
        ui = u[S:]                                               # Im = -sinS @ z
        # Chan DFT real part: Re((Ur + i*Ui) @ (cosC - i*sinC)) = Ur@cosC + Ui@sinC.
        return (jnp.dot(ur.astype(dft_dtype), cosc, preferred_element_type=jnp.float32)
                + jnp.dot(ui.astype(dft_dtype), sinc, preferred_element_type=jnp.float32))

    x = x_ref[...]                                               # (S, C) f32
    if L <= 8:
        for l in range(L):                # small L: full static unroll (LLO visibility)
            x = layer(l, x)
    else:
        # large L: bound vreg live ranges / spill pressure with a real loop
        x = lax.fori_loop(0, L, layer, x, unroll=2)

    o_ref[...] = x        # single store per block (lane-dense whenever C % 128 == 0)


def _dft_mats(S, C, dtype):
    """Ortho DFT matrices, built host-side in f64 with exact integer (n*k mod N) angles."""
    def cos_sin(n):
        idx = np.arange(n, dtype=np.int64)
        ang = 2.0 * np.pi * ((idx[:, None] * idx[None, :]) % n) / n
        scale = 1.0 / np.sqrt(n)
        return np.cos(ang) * scale, np.sin(ang) * scale

    cS, sS = cos_sin(S)
    cC, sC = cos_sin(C)
    css = np.concatenate([cS, -sS], axis=0)          # (2S, S): [Re ; Im] of seq-DFT matrix
    return (jnp.asarray(css, dtype),
            jnp.asarray(cC, dtype),
            jnp.asarray(sC, dtype))


def transformer_forward(x, W, b, *, matmul_dtype=jnp.bfloat16, dft_dtype=jnp.float32,
                        single_buffer_consts=True):
    """x: (B, S, C);  W: (L, C, C) PyTorch Linear weight (out, in);  b: (L, C)."""
    B, S, C = x.shape
    L = W.shape[0]

    css, cosc, sinc = _dft_mats(S, C, dft_dtype)
    Wt = jnp.transpose(W, (0, 2, 1)).astype(matmul_dtype)     # kernel computes x @ Wt[l]
    b3 = jnp.asarray(b, jnp.float32).reshape(L, 1, C)         # bias stays f32
    x = jnp.asarray(x, jnp.float32)                           # native (B,S,C): no transposes

    # ---- VMEM budget + cost estimate --------------------------------------------------
    mm_bytes = np.dtype(matmul_dtype).itemsize
    dft_bytes = np.dtype(dft_dtype).itemsize
    const_bytes = (L * C * C * mm_bytes + L * C * 4
                   + (2 * S * S + 2 * C * C) * dft_bytes)
    act_bytes = 2 * 2 * S * C * 4                 # in + out blocks, double-buffered
    interm_bytes = 8 * S * C * 4                  # rough per-layer live intermediates
    worst_case = 2 * const_bytes + act_bytes + interm_bytes   # 2x consts if double-buffered
    if worst_case > (56 << 20):
        # TODO(synk): fall back to layer-streaming grid=(B, L) (weights pipelined per
        # layer) instead of the all-resident design once this no longer fits v7x VMEM.
        raise NotImplementedError(
            "resident-weight kernel exceeds the 64 MiB (v7x) VMEM budget; needs layer streaming")
    vmem_limit = int(min(64 << 20, max(worst_case + (2 << 20), 32 << 20)))

    flops = B * L * (2 * S * C * C            # ForwardBlock matmul
                     + 2 * (2 * S) * S * C    # fused seq DFT
                     + 2 * 2 * S * C * C)     # chan DFT (cos + sin halves)
    bytes_accessed = 2 * B * S * C * 4 + const_bytes
    cost = pl.CostEstimate(flops=flops, transcendentals=0, bytes_accessed=bytes_accessed)

    def build(single_buffer):
        # Constant-index operands never change block over the grid -> single-buffer them
        # to halve the resident constant footprint (big lever on v7x's 64 MiB VMEM).
        ckw = dict(pipeline_mode=pl.Buffered(1)) if single_buffer else {}
        grid_spec = pltpu.PrefetchScalarGridSpec(
            num_scalar_prefetch=0,
            grid=(B,),                                        # one batch element per step
            in_specs=[
                pl.BlockSpec((None, S, C), lambda i: (i, 0, 0)),       # activation (S, C)
                pl.BlockSpec((L, C, C), lambda i: (0, 0, 0), **ckw),   # all weights resident
                pl.BlockSpec((L, 1, C), lambda i: (0, 0, 0), **ckw),   # all biases resident
                pl.BlockSpec((2 * S, S), lambda i: (0, 0), **ckw),     # fused seq-DFT matrix
                pl.BlockSpec((C, C), lambda i: (0, 0), **ckw),         # chan-DFT cos
                pl.BlockSpec((C, C), lambda i: (0, 0), **ckw),         # chan-DFT sin
            ],
            out_specs=pl.BlockSpec((None, S, C), lambda i: (i, 0, 0)),
        )
        return pl.pallas_call(
            _transformer_kernel,
            out_shape=jax.ShapeDtypeStruct((B, S, C), jnp.float32),
            grid_spec=grid_spec,
            compiler_params=pltpu.CompilerParams(
                dimension_semantics=("parallel",),     # batches independent -> megacore split
                vmem_limit_bytes=vmem_limit,
            ),
            cost_estimate=cost,
        )

    args = (x, Wt, b3, css, cosc, sinc)
    if single_buffer_consts:
        try:
            return jax.block_until_ready(build(True)(*args))
        except Exception:
            # pipeline_mode / pl.Buffered(1) not supported by this jax build:
            # fall back to default (double-buffered) constants.
            pass
    return build(False)(*args)


def _reference_numpy(x, W, b):
    """Pure numpy (f64) reference reproducing the PyTorch forward."""
    x = np.asarray(x, np.float64)
    W = np.asarray(W, np.float64)
    b = np.asarray(b, np.float64)
    for l in range(W.shape[0]):
        h = x @ W[l].T + b[l]
        z = h + x
        x = np.where(z >= 0, z, 0.2 * z)                     # leaky_relu(0.2)
        X = np.fft.fft(x, axis=-1, norm='ortho')             # channel FFT
        X = np.fft.fft(X, axis=-2, norm='ortho')             # sequence FFT
        x = X.real
    return x


if __name__ == "__main__":
    B, S, C, L = 2, 8, 32, 3

    key = jax.random.PRNGKey(0)
    kx, kw, kb = jax.random.split(key, 3)
    x = jax.random.normal(kx, (B, S, C), dtype=jnp.float32)
    # deterministic "init_weights = make_initializer(0.1)" stand-in
    W = 0.1 * jax.random.normal(kw, (L, C, C), dtype=jnp.float32)
    b = 0.1 * jax.random.normal(kb, (L, C), dtype=jnp.float32)

    ref = _reference_numpy(x, W, b)

    # Full-f32 MXU path: tight check against the f64 reference.
    out_f32 = jax.block_until_ready(
        transformer_forward(x, W, b, matmul_dtype=jnp.float32, dft_dtype=jnp.float32))
    np.testing.assert_allclose(np.asarray(out_f32), ref, rtol=2e-3, atol=2e-3)

    # Default path: bf16 weights on the MXU, f32 DFT constants, f32 accumulation.
    out_def = jax.block_until_ready(transformer_forward(x, W, b))
    np.testing.assert_allclose(np.asarray(out_def), ref, rtol=5e-2, atol=3e-2)

    print("KERNEL_OK")
</pallas_src>

<mosaic_0001>
module attributes {stable_mosaic.version = 11 : i64} {
  func.func @_transformer_kernel(%arg0: i32, %arg1: memref<1x8x32xf32, #tpu.memory_space<vmem>>, %arg2: memref<3x32x32xf32, #tpu.memory_space<vmem>>, %arg3: memref<3x1x32xf32, #tpu.memory_space<vmem>>, %arg4: memref<16x8xf32, #tpu.memory_space<vmem>>, %arg5: memref<32x32xf32, #tpu.memory_space<vmem>>, %arg6: memref<32x32xf32, #tpu.memory_space<vmem>>, %arg7: memref<1x8x32xf32, #tpu.memory_space<vmem>>) attributes {dimension_semantics = [#tpu.dimension_semantics<parallel>], iteration_bounds = array<i64: 2>, scalar_prefetch = 0 : i64, scratch_operands = 0 : i64, tpu.core_type = #tpu.core_type<tc>, window_params = [{transform_indices = @transform_0, window_bounds = array<i64: 1, 8, 32>}, {pipeline_mode = #tpu.pipeline_mode<synchronous>, transform_indices = @transform_1, window_bounds = array<i64: 3, 32, 32>}, {pipeline_mode = #tpu.pipeline_mode<synchronous>, transform_indices = @transform_2, window_bounds = array<i64: 3, 1, 32>}, {pipeline_mode = #tpu.pipeline_mode<synchronous>, transform_indices = @transform_3, window_bounds = array<i64: 16, 8>}, {pipeline_mode = #tpu.pipeline_mode<synchronous>, transform_indices = @transform_4, window_bounds = array<i64: 32, 32>}, {pipeline_mode = #tpu.pipeline_mode<synchronous>, transform_indices = @transform_5, window_bounds = array<i64: 32, 32>}, {transform_indices = @transform_6, window_bounds = array<i64: 1, 8, 32>}]} {
    %c0 = arith.constant 0 : index
    %c0_0 = arith.constant 0 : index
    %0 = vector.load %arg4[%c0, %c0_0] : memref<16x8xf32, #tpu.memory_space<vmem>>, vector<16x8xf32>
    %c0_1 = arith.constant 0 : index
    %c0_2 = arith.constant 0 : index
    %1 = vector.load %arg5[%c0_1, %c0_2] : memref<32x32xf32, #tpu.memory_space<vmem>>, vector<32x32xf32>
    %c0_3 = arith.constant 0 : index
    %c0_4 = arith.constant 0 : index
    %2 = vector.load %arg6[%c0_3, %c0_4] : memref<32x32xf32, #tpu.memory_space<vmem>>, vector<32x32xf32>
    %c0_5 = arith.constant 0 : index
    %c0_6 = arith.constant 0 : index
    %c0_7 = arith.constant 0 : index
    %3 = vector.load %arg1[%c0_5, %c0_6, %c0_7] : memref<1x8x32xf32, #tpu.memory_space<vmem>>, vector<1x8x32xf32>
    %4 = vector.shape_cast %3 : vector<1x8x32xf32> to vector<8x32xf32>
    %c0_8 = arith.constant 0 : index
    %c0_9 = arith.constant 0 : index
    %c0_10 = arith.constant 0 : index
    %5 = vector.load %arg2[%c0_8, %c0_9, %c0_10] : memref<3x32x32xf32, #tpu.memory_space<vmem>>, vector<1x32x32xf32>
    %6 = vector.shape_cast %5 : vector<1x32x32xf32> to vector<32x32xf32>
    %cst = arith.constant dense<0.000000e+00> : vector<8x32xf32>
    %7 = tpu.matmul %4, %6, %cst {dimension_numbers = #tpu.dot_dimension_numbers<[1], [0], [0], [1], [0, 0, 1, 1], [], []>} : vector<8x32xf32>, vector<32x32xf32>, vector<8x32xf32> -> vector<8x32xf32>
    %c0_11 = arith.constant 0 : index
    %c0_12 = arith.constant 0 : index
    %c0_13 = arith.constant 0 : index
    %8 = vector.load %arg3[%c0_11, %c0_12, %c0_13] : memref<3x1x32xf32, #tpu.memory_space<vmem>>, vector<1x1x32xf32>
    %9 = vector.shape_cast %8 : vector<1x1x32xf32> to vector<1x32xf32>
    %10 = vector.broadcast %9 : vector<1x32xf32> to vector<8x32xf32>
    %11 = arith.addf %7, %10 : vector<8x32xf32>
    %12 = arith.addf %11, %4 : vector<8x32xf32>
    %cst_14 = arith.constant 0.000000e+00 : f32
    %13 = vector.broadcast %cst_14 : f32 to vector<8x32xf32>
    %14 = arith.cmpf oge, %12, %13 : vector<8x32xf32>
    %cst_15 = arith.constant 2.000000e-01 : f32
    %15 = vector.broadcast %cst_15 : f32 to vector<8x32xf32>
    %16 = arith.mulf %15, %12 : vector<8x32xf32>
    %17 = arith.select %14, %12, %16 : vector<8x32xi1>, vector<8x32xf32>
    %cst_16 = arith.constant dense<0.000000e+00> : vector<16x32xf32>
    %18 = tpu.matmul %0, %17, %cst_16 {dimension_numbers = #tpu.dot_dimension_numbers<[1], [0], [0], [1], [0, 0, 1, 1], [], []>} : vector<16x8xf32>, vector<8x32xf32>, vector<16x32xf32> -> vector<16x32xf32>
    %19 = vector.extract_strided_slice %18 {offsets = [0, 0], sizes = [8, 32], strides = [1, 1]} : vector<16x32xf32> to vector<8x32xf32>
    %20 = vector.extract_strided_slice %18 {offsets = [8, 0], sizes = [8, 32], strides = [1, 1]} : vector<16x32xf32> to vector<8x32xf32>
    %cst_17 = arith.constant dense<0.000000e+00> : vector<8x32xf32>
    %21 = tpu.matmul %19, %1, %cst_17 {dimension_numbers = #tpu.dot_dimension_numbers<[1], [0], [0], [1], [0, 0, 1, 1], [], []>} : vector<8x32xf32>, vector<32x32xf32>, vector<8x32xf32> -> vector<8x32xf32>
    %cst_18 = arith.constant dense<0.000000e+00> : vector<8x32xf32>
    %22 = tpu.matmul %20, %2, %cst_18 {dimension_numbers = #tpu.dot_dimension_numbers<[1], [0], [0], [1], [0, 0, 1, 1], [], []>} : vector<8x32xf32>, vector<32x32xf32>, vector<8x32xf32> -> vector<8x32xf32>
    %23 = arith.addf %21, %22 : vector<8x32xf32>
    %c1 = arith.constant 1 : index
    %c0_19 = arith.constant 0 : index
    %c0_20 = arith.constant 0 : index
    %24 = vector.load %arg2[%c1, %c0_19, %c0_20] : memref<3x32x32xf32, #tpu.memory_space<vmem>>, vector<1x32x32xf32>
    %25 = vector.shape_cast %24 : vector<1x32x32xf32> to vector<32x32xf32>
    %cst_21 = arith.constant dense<0.000000e+00> : vector<8x32xf32>
    %26 = tpu.matmul %23, %25, %cst_21 {dimension_numbers = #tpu.dot_dimension_numbers<[1], [0], [0], [1], [0, 0, 1, 1], [], []>} : vector<8x32xf32>, vector<32x32xf32>, vector<8x32xf32> -> vector<8x32xf32>
    %c1_22 = arith.constant 1 : index
    %c0_23 = arith.constant 0 : index
    %c0_24 = arith.constant 0 : index
    %27 = vector.load %arg3[%c1_22, %c0_23, %c0_24] : memref<3x1x32xf32, #tpu.memory_space<vmem>>, vector<1x1x32xf32>
    %28 = vector.shape_cast %27 : vector<1x1x32xf32> to vector<1x32xf32>
    %29 = vector.broadcast %28 : vector<1x32xf32> to vector<8x32xf32>
    %30 = arith.addf %26, %29 : vector<8x32xf32>
    %31 = arith.addf %30, %23 : vector<8x32xf32>
    %cst_25 = arith.constant 0.000000e+00 : f32
    %32 = vector.broadcast %cst_25 : f32 to vector<8x32xf32>
    %33 = arith.cmpf oge, %31, %32 : vector<8x32xf32>
    %cst_26 = arith.constant 2.000000e-01 : f32
    %34 = vector.broadcast %cst_26 : f32 to vector<8x32xf32>
    %35 = arith.mulf %34, %31 : vector<8x32xf32>
    %36 = arith.select %33, %31, %35 : vector<8x32xi1>, vector<8x32xf32>
    %cst_27 = arith.constant dense<0.000000e+00> : vector<16x32xf32>
    %37 = tpu.matmul %0, %36, %cst_27 {dimension_numbers = #tpu.dot_dimension_numbers<[1], [0], [0], [1], [0, 0, 1, 1], [], []>} : vector<16x8xf32>, vector<8x32xf32>, vector<16x32xf32> -> vector<16x32xf32>
    %38 = vector.extract_strided_slice %37 {offsets = [0, 0], sizes = [8, 32], strides = [1, 1]} : vector<16x32xf32> to vector<8x32xf32>
    %39 = vector.extract_strided_slice %37 {offsets = [8, 0], sizes = [8, 32], strides = [1, 1]} : vector<16x32xf32> to vector<8x32xf32>
    %cst_28 = arith.constant dense<0.000000e+00> : vector<8x32xf32>
    %40 = tpu.matmul %38, %1, %cst_28 {dimension_numbers = #tpu.dot_dimension_numbers<[1], [0], [0], [1], [0, 0, 1, 1], [], []>} : vector<8x32xf32>, vector<32x32xf32>, vector<8x32xf32> -> vector<8x32xf32>
    %cst_29 = arith.constant dense<0.000000e+00> : vector<8x32xf32>
    %41 = tpu.matmul %39, %2, %cst_29 {dimension_numbers = #tpu.dot_dimension_numbers<[1], [0], [0], [1], [0, 0, 1, 1], [], []>} : vector<8x32xf32>, vector<32x32xf32>, vector<8x32xf32> -> vector<8x32xf32>
    %42 = arith.addf %40, %41 : vector<8x32xf32>
    %c2 = arith.constant 2 : index
    %c0_30 = arith.constant 0 : index
    %c0_31 = arith.constant 0 : index
    %43 = vector.load %arg2[%c2, %c0_30, %c0_31] : memref<3x32x32xf32, #tpu.memory_space<vmem>>, vector<1x32x32xf32>
    %44 = vector.shape_cast %43 : vector<1x32x32xf32> to vector<32x32xf32>
    %cst_32 = arith.constant dense<0.000000e+00> : vector<8x32xf32>
    %45 = tpu.matmul %42, %44, %cst_32 {dimension_numbers = #tpu.dot_dimension_numbers<[1], [0], [0], [1], [0, 0, 1, 1], [], []>} : vector<8x32xf32>, vector<32x32xf32>, vector<8x32xf32> -> vector<8x32xf32>
    %c2_33 = arith.constant 2 : index
    %c0_34 = arith.constant 0 : index
    %c0_35 = arith.constant 0 : index
    %46 = vector.load %arg3[%c2_33, %c0_34, %c0_35] : memref<3x1x32xf32, #tpu.memory_space<vmem>>, vector<1x1x32xf32>
    %47 = vector.shape_cast %46 : vector<1x1x32xf32> to vector<1x32xf32>
    %48 = vector.broadcast %47 : vector<1x32xf32> to vector<8x32xf32>
    %49 = arith.addf %45, %48 : vector<8x32xf32>
    %50 = arith.addf %49, %42 : vector<8x32xf32>
    %cst_36 = arith.constant 0.000000e+00 : f32
    %51 = vector.broadcast %cst_36 : f32 to vector<8x32xf32>
    %52 = arith.cmpf oge, %50, %51 : vector<8x32xf32>
    %cst_37 = arith.constant 2.000000e-01 : f32
    %53 = vector.broadcast %cst_37 : f32 to vector<8x32xf32>
    %54 = arith.mulf %53, %50 : vector<8x32xf32>
    %55 = arith.select %52, %50, %54 : vector<8x32xi1>, vector<8x32xf32>
    %cst_38 = arith.constant dense<0.000000e+00> : vector<16x32xf32>
    %56 = tpu.matmul %0, %55, %cst_38 {dimension_numbers = #tpu.dot_dimension_numbers<[1], [0], [0], [1], [0, 0, 1, 1], [], []>} : vector<16x8xf32>, vector<8x32xf32>, vector<16x32xf32> -> vector<16x32xf32>
    %57 = vector.extract_strided_slice %56 {offsets = [0, 0], sizes = [8, 32], strides = [1, 1]} : vector<16x32xf32> to vector<8x32xf32>
    %58 = vector.extract_strided_slice %56 {offsets = [8, 0], sizes = [8, 32], strides = [1, 1]} : vector<16x32xf32> to vector<8x32xf32>
    %cst_39 = arith.constant dense<0.000000e+00> : vector<8x32xf32>
    %59 = tpu.matmul %57, %1, %cst_39 {dimension_numbers = #tpu.dot_dimension_numbers<[1], [0], [0], [1], [0, 0, 1, 1], [], []>} : vector<8x32xf32>, vector<32x32xf32>, vector<8x32xf32> -> vector<8x32xf32>
    %cst_40 = arith.constant dense<0.000000e+00> : vector<8x32xf32>
    %60 = tpu.matmul %58, %2, %cst_40 {dimension_numbers = #tpu.dot_dimension_numbers<[1], [0], [0], [1], [0, 0, 1, 1], [], []>} : vector<8x32xf32>, vector<32x32xf32>, vector<8x32xf32> -> vector<8x32xf32>
    %61 = arith.addf %59, %60 : vector<8x32xf32>
    %c0_41 = arith.constant 0 : index
    %c0_42 = arith.constant 0 : index
    %c0_43 = arith.constant 0 : index
    %62 = vector.load %arg7[%c0_41, %c0_42, %c0_43] : memref<1x8x32xf32, #tpu.memory_space<vmem>>, vector<1x8x32xf32>
    %63 = vector.shape_cast %62 : vector<1x8x32xf32> to vector<8x32xf32>
    %64 = vector.shape_cast %61 : vector<8x32xf32> to vector<1x8x32xf32>
    tpu.vector_store %arg7[%c0_41, %c0_42, %c0_43], %64 {strides = array<i32>} : memref<1x8x32xf32, #tpu.memory_space<vmem>>, vector<1x8x32xf32>,
    return
  }
  func.func @transform_0(%arg0: i32) -> (i32, i32, i32) {
    %c0_i32 = arith.constant 0 : i32
    %c0_i32_0 = arith.constant 0 : i32
    %c0_i32_1 = arith.constant 0 : i32
    return %arg0, %c0_i32, %c0_i32_0 : i32, i32, i32
  }
  func.func @transform_1(%arg0: i32) -> (i32, i32, i32) {
    %c0_i32 = arith.constant 0 : i32
    %c0_i32_0 = arith.constant 0 : i32
    %c0_i32_1 = arith.constant 0 : i32
    %c0_i32_2 = arith.constant 0 : i32
    return %c0_i32, %c0_i32_0, %c0_i32_1 : i32, i32, i32
  }
  func.func @transform_2(%arg0: i32) -> (i32, i32, i32) {
    %c0_i32 = arith.constant 0 : i32
    %c0_i32_0 = arith.constant 0 : i32
    %c0_i32_1 = arith.constant 0 : i32
    %c0_i32_2 = arith.constant 0 : i32
    return %c0_i32, %c0_i32_0, %c0_i32_1 : i32, i32, i32
  }
  func.func @transform_3(%arg0: i32) -> (i32, i32) {
    %c0_i32 = arith.constant 0 : i32
    %c0_i32_0 = arith.constant 0 : i32
    %c0_i32_1 = arith.constant 0 : i32
    return %c0_i32, %c0_i32_0 : i32, i32
  }
  func.func @transform_4(%arg0: i32) -> (i32, i32) {
    %c0_i32 = arith.constant 0 : i32
    %c0_i32_0 = arith.constant 0 : i32
    %c0_i32_1 = arith.constant 0 : i32
    return %c0_i32, %c0_i32_0 : i32, i32
  }
  func.func @transform_5(%arg0: i32) -> (i32, i32) {
    %c0_i32 = arith.constant 0 : i32
    %c0_i32_0 = arith.constant 0 : i32
    %c0_i32_1 = arith.constant 0 : i32
    return %c0_i32, %c0_i32_0 : i32, i32
  }
  func.func @transform_6(%arg0: i32) -> (i32, i32, i32) {
    %c0_i32 = arith.constant 0 : i32
    %c0_i32_0 = arith.constant 0 : i32
    %c0_i32_1 = arith.constant 0 : i32
    return %arg0, %c0_i32, %c0_i32_0 : i32, i32, i32
  }
}

module attributes {stable_mosaic.version = 11 : i64} {
  func.func @_transformer_kernel(%arg0: i32, %arg1: memref<1x8x32xf32, #tpu.memory_space<vmem>>, %arg2: memref<3x32x32xf32, #tpu.memory_space<vmem>>, %arg3: memref<3x1x32xf32, #tpu.memory_space<vmem>>, %arg4: memref<16x8xf32, #tpu.memory_space<vmem>>, %arg5: memref<32x32xf32, #tpu.memory_space<vmem>>, %arg6: memref<32x32xf32, #tpu.memory_space<vmem>>, %arg7: memref<1x8x32xf32, #tpu.memory_space<vmem>>) attributes {dimension_semantics = [#tpu.dimension_semantics<parallel>], iteration_bounds = array<i64: 2>, scalar_prefetch = 0 : i64, scratch_operands = 0 : i64, tpu.core_type = #tpu.core_type<tc>, window_params = [{transform_indices = @transform_0, window_bounds = array<i64: 1, 8, 32>}, {pipeline_mode = #tpu.pipeline_mode<synchronous>, transform_indices = @transform_1, window_bounds = array<i64: 3, 32, 32>}, {pipeline_mode = #tpu.pipeline_mode<synchronous>, transform_indices = @transform_2, window_bounds = array<i64: 3, 1, 32>}, {pipeline_mode = #tpu.pipeline_mode<synchronous>, transform_indices = @transform_3, window_bounds = array<i64: 16, 8>}, {pipeline_mode = #tpu.pipeline_mode<synchronous>, transform_indices = @transform_4, window_bounds = array<i64: 32, 32>}, {pipeline_mode = #tpu.pipeline_mode<synchronous>, transform_indices = @transform_5, window_bounds = array<i64: 32, 32>}, {transform_indices = @transform_6, window_bounds = array<i64: 1, 8, 32>}]} {
    %c0 = arith.constant 0 : index
    %c0_0 = arith.constant 0 : index
    %0 = vector.load %arg4[%c0, %c0_0] : memref<16x8xf32, #tpu.memory_space<vmem>>, vector<16x8xf32>
    %c0_1 = arith.constant 0 : index
    %c0_2 = arith.constant 0 : index
    %1 = vector.load %arg5[%c0_1, %c0_2] : memref<32x32xf32, #tpu.memory_space<vmem>>, vector<32x32xf32>
    %c0_3 = arith.constant 0 : index
    %c0_4 = arith.constant 0 : index
    %2 = vector.load %arg6[%c0_3, %c0_4] : memref<32x32xf32, #tpu.memory_space<vmem>>, vector<32x32xf32>
    %c0_5 = arith.constant 0 : index
    %c0_6 = arith.constant 0 : index
    %c0_7 = arith.constant 0 : index
    %3 = vector.load %arg1[%c0_5, %c0_6, %c0_7] : memref<1x8x32xf32, #tpu.memory_space<vmem>>, vector<1x8x32xf32>
    %4 = vector.shape_cast %3 : vector<1x8x32xf32> to vector<8x32xf32>
    %c0_8 = arith.constant 0 : index
    %c0_9 = arith.constant 0 : index
    %c0_10 = arith.constant 0 : index
    %5 = vector.load %arg2[%c0_8, %c0_9, %c0_10] : memref<3x32x32xf32, #tpu.memory_space<vmem>>, vector<1x32x32xf32>
    %6 = vector.shape_cast %5 : vector<1x32x32xf32> to vector<32x32xf32>
    %cst = arith.constant dense<0.000000e+00> : vector<8x32xf32>
    %7 = tpu.matmul %4, %6, %cst {dimension_numbers = #tpu.dot_dimension_numbers<[1], [0], [0], [1], [0, 0, 1, 1], [], []>} : vector<8x32xf32>, vector<32x32xf32>, vector<8x32xf32> -> vector<8x32xf32>
    %c0_11 = arith.constant 0 : index
    %c0_12 = arith.constant 0 : index
    %c0_13 = arith.constant 0 : index
    %8 = vector.load %arg3[%c0_11, %c0_12, %c0_13] : memref<3x1x32xf32, #tpu.memory_space<vmem>>, vector<1x1x32xf32>
    %9 = vector.shape_cast %8 : vector<1x1x32xf32> to vector<1x32xf32>
    %10 = vector.broadcast %9 : vector<1x32xf32> to vector<8x32xf32>
    %11 = arith.addf %7, %10 : vector<8x32xf32>
    %12 = arith.addf %11, %4 : vector<8x32xf32>
    %cst_14 = arith.constant 0.000000e+00 : f32
    %13 = vector.broadcast %cst_14 : f32 to vector<8x32xf32>
    %14 = arith.cmpf oge, %12, %13 : vector<8x32xf32>
    %cst_15 = arith.constant 2.000000e-01 : f32
    %15 = vector.broadcast %cst_15 : f32 to vector<8x32xf32>
    %16 = arith.mulf %15, %12 : vector<8x32xf32>
    %17 = arith.select %14, %12, %16 : vector<8x32xi1>, vector<8x32xf32>
    %cst_16 = arith.constant dense<0.000000e+00> : vector<16x32xf32>
    %18 = tpu.matmul %0, %17, %cst_16 {dimension_numbers = #tpu.dot_dimension_numbers<[1], [0], [0], [1], [0, 0, 1, 1], [], []>} : vector<16x8xf32>, vector<8x32xf32>, vector<16x32xf32> -> vector<16x32xf32>
    %19 = vector.extract_strided_slice %18 {offsets = [0, 0], sizes = [8, 32], strides = [1, 1]} : vector<16x32xf32> to vector<8x32xf32>
    %20 = vector.extract_strided_slice %18 {offsets = [8, 0], sizes = [8, 32], strides = [1, 1]} : vector<16x32xf32> to vector<8x32xf32>
    %cst_17 = arith.constant dense<0.000000e+00> : vector<8x32xf32>
    %21 = tpu.matmul %19, %1, %cst_17 {dimension_numbers = #tpu.dot_dimension_numbers<[1], [0], [0], [1], [0, 0, 1, 1], [], []>} : vector<8x32xf32>, vector<32x32xf32>, vector<8x32xf32> -> vector<8x32xf32>
    %cst_18 = arith.constant dense<0.000000e+00> : vector<8x32xf32>
    %22 = tpu.matmul %20, %2, %cst_18 {dimension_numbers = #tpu.dot_dimension_numbers<[1], [0], [0], [1], [0, 0, 1, 1], [], []>} : vector<8x32xf32>, vector<32x32xf32>, vector<8x32xf32> -> vector<8x32xf32>
    %23 = arith.addf %21, %22 : vector<8x32xf32>
    %c1 = arith.constant 1 : index
    %c0_19 = arith.constant 0 : index
    %c0_20 = arith.constant 0 : index
    %24 = vector.load %arg2[%c1, %c0_19, %c0_20] : memref<3x32x32xf32, #tpu.memory_space<vmem>>, vector<1x32x32xf32>
    %25 = vector.shape_cast %24 : vector<1x32x32xf32> to vector<32x32xf32>
    %cst_21 = arith.constant dense<0.000000e+00> : vector<8x32xf32>
    %26 = tpu.matmul %23, %25, %cst_21 {dimension_numbers = #tpu.dot_dimension_numbers<[1], [0], [0], [1], [0, 0, 1, 1], [], []>} : vector<8x32xf32>, vector<32x32xf32>, vector<8x32xf32> -> vector<8x32xf32>
    %c1_22 = arith.constant 1 : index
    %c0_23 = arith.constant 0 : index
    %c0_24 = arith.constant 0 : index
    %27 = vector.load %arg3[%c1_22, %c0_23, %c0_24] : memref<3x1x32xf32, #tpu.memory_space<vmem>>, vector<1x1x32xf32>
    %28 = vector.shape_cast %27 : vector<1x1x32xf32> to vector<1x32xf32>
    %29 = vector.broadcast %28 : vector<1x32xf32> to vector<8x32xf32>
    %30 = arith.addf %26, %29 : vector<8x32xf32>
    %31 = arith.addf %30, %23 : vector<8x32xf32>
    %cst_25 = arith.constant 0.000000e+00 : f32
    %32 = vector.broadcast %cst_25 : f32 to vector<8x32xf32>
    %33 = arith.cmpf oge, %31, %32 : vector<8x32xf32>
    %cst_26 = arith.constant 2.000000e-01 : f32
    %34 = vector.broadcast %cst_26 : f32 to vector<8x32xf32>
    %35 = arith.mulf %34, %31 : vector<8x32xf32>
    %36 = arith.select %33, %31, %35 : vector<8x32xi1>, vector<8x32xf32>
    %cst_27 = arith.constant dense<0.000000e+00> : vector<16x32xf32>
    %37 = tpu.matmul %0, %36, %cst_27 {dimension_numbers = #tpu.dot_dimension_numbers<[1], [0], [0], [1], [0, 0, 1, 1], [], []>} : vector<16x8xf32>, vector<8x32xf32>, vector<16x32xf32> -> vector<16x32xf32>
    %38 = vector.extract_strided_slice %37 {offsets = [0, 0], sizes = [8, 32], strides = [1, 1]} : vector<16x32xf32> to vector<8x32xf32>
    %39 = vector.extract_strided_slice %37 {offsets = [8, 0], sizes = [8, 32], strides = [1, 1]} : vector<16x32xf32> to vector<8x32xf32>
    %cst_28 = arith.constant dense<0.000000e+00> : vector<8x32xf32>
    %40 = tpu.matmul %38, %1, %cst_28 {dimension_numbers = #tpu.dot_dimension_numbers<[1], [0], [0], [1], [0, 0, 1, 1], [], []>} : vector<8x32xf32>, vector<32x32xf32>, vector<8x32xf32> -> vector<8x32xf32>
    %cst_29 = arith.constant dense<0.000000e+00> : vector<8x32xf32>
    %41 = tpu.matmul %39, %2, %cst_29 {dimension_numbers = #tpu.dot_dimension_numbers<[1], [0], [0], [1], [0, 0, 1, 1], [], []>} : vector<8x32xf32>, vector<32x32xf32>, vector<8x32xf32> -> vector<8x32xf32>
    %42 = arith.addf %40, %41 : vector<8x32xf32>
    %c2 = arith.constant 2 : index
    %c0_30 = arith.constant 0 : index
    %c0_31 = arith.constant 0 : index
    %43 = vector.load %arg2[%c2, %c0_30, %c0_31] : memref<3x32x32xf32, #tpu.memory_space<vmem>>, vector<1x32x32xf32>
    %44 = vector.shape_cast %43 : vector<1x32x32xf32> to vector<32x32xf32>
    %cst_32 = arith.constant dense<0.000000e+00> : vector<8x32xf32>
    %45 = tpu.matmul %42, %44, %cst_32 {dimension_numbers = #tpu.dot_dimension_numbers<[1], [0], [0], [1], [0, 0, 1, 1], [], []>} : vector<8x32xf32>, vector<32x32xf32>, vector<8x32xf32> -> vector<8x32xf32>
    %c2_33 = arith.constant 2 : index
    %c0_34 = arith.constant 0 : index
    %c0_35 = arith.constant 0 : index
    %46 = vector.load %arg3[%c2_33, %c0_34, %c0_35] : memref<3x1x32xf32, #tpu.memory_space<vmem>>, vector<1x1x32xf32>
    %47 = vector.shape_cast %46 : vector<1x1x32xf32> to vector<1x32xf32>
    %48 = vector.broadcast %47 : vector<1x32xf32> to vector<8x32xf32>
    %49 = arith.addf %45, %48 : vector<8x32xf32>
    %50 = arith.addf %49, %42 : vector<8x32xf32>
    %cst_36 = arith.constant 0.000000e+00 : f32
    %51 = vector.broadcast %cst_36 : f32 to vector<8x32xf32>
    %52 = arith.cmpf oge, %50, %51 : vector<8x32xf32>
    %cst_37 = arith.constant 2.000000e-01 : f32
    %53 = vector.broadcast %cst_37 : f32 to vector<8x32xf32>
    %54 = arith.mulf %53, %50 : vector<8x32xf32>
    %55 = arith.select %52, %50, %54 : vector<8x32xi1>, vector<8x32xf32>
    %cst_38 = arith.constant dense<0.000000e+00> : vector<16x32xf32>
    %56 = tpu.matmul %0, %55, %cst_38 {dimension_numbers = #tpu.dot_dimension_numbers<[1], [0], [0], [1], [0, 0, 1, 1], [], []>} : vector<16x8xf32>, vector<8x32xf32>, vector<16x32xf32> -> vector<16x32xf32>
    %57 = vector.extract_strided_slice %56 {offsets = [0, 0], sizes = [8, 32], strides = [1, 1]} : vector<16x32xf32> to vector<8x32xf32>
    %58 = vector.extract_strided_slice %56 {offsets = [8, 0], sizes = [8, 32], strides = [1, 1]} : vector<16x32xf32> to vector<8x32xf32>
    %cst_39 = arith.constant dense<0.000000e+00> : vector<8x32xf32>
    %59 = tpu.matmul %57, %1, %cst_39 {dimension_numbers = #tpu.dot_dimension_numbers<[1], [0], [0], [1], [0, 0, 1, 1], [], []>} : vector<8x32xf32>, vector<32x32xf32>, vector<8x32xf32> -> vector<8x32xf32>
    %cst_40 = arith.constant dense<0.000000e+00> : vector<8x32xf32>
    %60 = tpu.matmul %58, %2, %cst_40 {dimension_numbers = #tpu.dot_dimension_numbers<[1], [0], [0], [1], [0, 0, 1, 1], [], []>} : vector<8x32xf32>, vector<32x32xf32>, vector<8x32xf32> -> vector<8x32xf32>
    %61 = arith.addf %59, %60 : vector<8x32xf32>
    %c0_41 = arith.constant 0 : index
    %c0_42 = arith.constant 0 : index
    %c0_43 = arith.constant 0 : index
    %62 = vector.load %arg7[%c0_41, %c0_42, %c0_43] : memref<1x8x32xf32, #tpu.memory_space<vmem>>, vector<1x8x32xf32>
    %63 = vector.shape_cast %62 : vector<1x8x32xf32> to vector<8x32xf32>
    %64 = vector.shape_cast %61 : vector<8x32xf32> to vector<1x8x32xf32>
    tpu.vector_store %arg7[%c0_41, %c0_42, %c0_43], %64 {strides = array<i32>} : memref<1x8x32xf32, #tpu.memory_space<vmem>>, vector<1x8x32xf32>,
    return
  }
  func.func @transform_0(%arg0: i32) -> (i32, i32, i32) {
    %c0_i32 = arith.constant 0 : i32
    %c0_i32_0 = arith.constant 0 : i32
    %c0_i32_1 = arith.constant 0 : i32
    return %arg0, %c0_i32, %c0_i32_0 : i32, i32, i32
  }
  func.func @transform_1(%arg0: i32) -> (i32, i32, i32) {
    %c0_i32 = arith.constant 0 : i32
    %c0_i32_0 = arith.constant 0 : i32
    %c0_i32_1 = arith.constant 0 : i32
    %c0_i32_2 = arith.constant 0 : i32
    return %c0_i32, %c0_i32_0, %c0_i32_1 : i32, i32, i32
  }
  func.func @transform_2(%arg0: i32) -> (i32, i32, i32) {
    %c0_i32 = arith.constant 0 : i32
    %c0_i32_0 = arith.constant 0 : i32
    %c0_i32_1 = arith.constant 0 : i32
    %c0_i32_2 = arith.constant 0 : i32
    return %c0_i32, %c0_i32_0, %c0_i32_1 : i32, i32, i32
  }
  func.func @transform_3(%arg0: i32) -> (i32, i32) {
    %c0_i32 = arith.constant 0 : i32
    %c0_i32_0 = arith.constant 0 : i32
    %c0_i32_1 = arith.constant 0 : i32
    return %c0_i32, %c0_i32_0 : i32, i32
  }
  func.func @transform_4(%arg0: i32) -> (i32, i32) {
    %c0_i32 = arith.constant 0 : i32
    %c0_i32_0 = arith.constant 0 : i32
    %c0_i32_1 = arith.constant 0 : i32
    return %c0_i32, %c0_i32_0 : i32, i32
  }
  func.func @transform_5(%arg0: i32) -> (i32, i32) {
    %c0_i32 = arith.constant 0 : i32
    %c0_i32_0 = arith.constant 0 : i32
    %c0_i32_1 = arith.constant 0 : i32
    return %c0_i32, %c0_i32_0 : i32, i32
  }
  func.func @transform_6(%arg0: i32) -> (i32, i32, i32) {
    %c0_i32 = arith.constant 0 : i32
    %c0_i32_0 = arith.constant 0 : i32
    %c0_i32_1 = arith.constant 0 : i32
    return %arg0, %c0_i32, %c0_i32_0 : i32, i32, i32
  }
}

</mosaic_0001>

<bundles_post_ra>
// kernel: tpu_custom_call.1
= control target key start
LH: loop header
LB: loop body
LE: loop exit
PB: predicated region body
PF: predicated region fallthrough
CT: control target
= control target key end

     0   :  { %11 = vsyncpa [#allocation3], 0  ;;  %s2230_s0 = inlined_call_operand.hbm [shape: f32[2,8,32], index: 0, kind: input, shape index: {}]   ;;  %s2231_s1 = inlined_call_operand.hbm [shape: f32[3,32,32], index: 1, kind: input, shape index: {}]   ;;  %s2232_s2 = inlined_call_operand.vmem [shape: f32[3,1,32], index: 2, kind: input, shape index: {}]   ;;  %s2233_s3 = inlined_call_operand.vmem [shape: f32[16,8], index: 3, kind: input, shape index: {}]   ;;  %s2234_s4 = inlined_call_operand.vmem [shape: f32[32,32], index: 4, kind: input, shape index: {}]   ;;  %s2235_s5 = inlined_call_operand.hbm [shape: f32[32,32], index: 5, kind: input, shape index: {}]   ;;  %s2236_s6 = inlined_call_operand.hbm [shape: f32[2,8,32], index: 6, kind: output, shape index: {}]  }
   0x1   :  { %13 = vsyncpa [#allocation3 + $0x1], 0 }
   0x2   :  { %14 = vsyncpa [#allocation6], 0 }
   0x3   :  { %15 = vsyncpa [#allocation4], 0 }
   0x4   :  { %17 = vsyncpa [#allocation4 + $0x1], 0  ;;  %s1888_s21 = smov 0   ;;  %s1890_s22 = smov 0  }
   0x5   :  { %s1892_s23 = smov 0   ;;  %s1894_s24 = smov 0  }
   0x6 LB: > { %s1909_s25 = sadd.s32 4294967295, %s1842_s24   ;;  %s1350_s26 = sadd.s32 4294967294, %s1842_s24   ;;  %s1842_s24 = sphi %s1894_s24, %s2256_s24   ;;  %s1838_s23 = sphi %s1892_s23, %s2255_s23   ;;  %s1834_s22 = sphi %s1890_s22, %s2254_s22   ;;  %s1830_s21 = sphi %s1888_s21, %s2253_s21  }
   0x7   : > { %p43_p0 = scmp.ne.s32.totalorder %s1834_s22, %s1830_s21  ;;  %p2237_p1 = scmp.eq.s32.totalorder %s1909_s25, 0 }
   0x8   : > { %p178_p3 = scmp.eq.s32.totalorder %s1350_s26, 1  ;;  %p1351_p5 = scmp.ge.s32.totalorder %s1842_s24, 1 }
   0x9   : > { %p1918_p4 = por %p2237_p1, %p43_p0  ;;  %p185_p7 = scmp.lt.s32.totalorder %s1842_s24, 3 }
   0xa   : > { %p1923_p6 = por %p178_p3, %p43_p0  ;;  %s1844_s30 = smov [#allocation5]  }
   0xb   : > { %s2240_s27 = scalar_select %p1918_p4, 1, 0 }
   0xc   : > { %s2241_s28 = scalar_select %p1923_p6, 1, 0 }
   0xd   : > { %p1928_p8 = pnand %p1351_p5, %p185_p7  ;;  %s197_s7 = sshll.u32 %s1844_s30, 4  ;;  %s1932_s7 = int_to_ptr.vmem [resolvable:$true] %s197_s7 }
   0xe   : > { %s1845_s9 = smov [#allocation7]   ;;  %s1686_s13 = scalar_lea.hbm %s2231_s1, 1536 }
   0xf   : > { %p1626_p9 = pneg %p1928_p8  ;;  %s219_s10 = sshll.u32 %s1845_s9, 4  ;;  %s1943_s10 = int_to_ptr.vmem [resolvable:$true] %s219_s10 }
  0x10   : > { %p1687_p12 = scmp.ne.s32.totalorder %s2231_s1, %s1686_s13  ;;  %p1693_p5 = scmp.lt.u32.totalorder %s1686_s13, %s2231_s1 }
  0x11   : > { %p1939_p11 = pnand %p1626_p9, %p2237_p1 }
  0x13   : > { %p1688_p13 = pneg %p1939_p11 }
  0x15   : > { %p1689_p0 = pnand %p1688_p13, %p1687_p12 }
  0x17   : > { %p1690_p3 = pneg %p1689_p0 }
  0x19   : > { %p1695_p7 = pnand %p1693_p5, %p1690_p3 }
  0x1b   : > { %1698 = shalt.err (!%p1695_p7)
}
  0x1c   : > { %s1699_s18 = scalar_lea.vmem %s1932_s7, 1536  ;;  %p1707_p2 = scmp.lt.s32.totalorder %s1932_s7, %s1932_s7 }
  0x1d   : > { %p1700_p9 = scmp.ne.s32.totalorder %s1932_s7, %s1699_s18  ;;  %p1708_p12 = scmp.lt.s32.totalorder %s1699_s18, %s1699_s18 }
  0x1f   : > { %p1702_p10 = pnand %p1700_p9, %p1688_p13  ;;  %p1709_p0 = por %p1708_p12, %p1707_p2 }
  0x21   : > { %p1703_p1 = pneg %p1702_p10 }
  0x23   : > { %p1710_p6 = pnand %p1709_p0, %p1703_p1 }
  0x25   : > { %1713 = shalt.err (!%p1710_p6)
}
  0x26   : > { %s1846_s19 = smov 128   ;;  %s1847_s20 = smov 8  }
  0x27   : > { %1629 = dma.hbm_to_vmem [thread:$0]  (!%p1939_p11), %s2231_s1, 1536, %s1932_s7, [#allocation6], %s1846_s19, %s1846_s19, %s1847_s20  }
  0x28   : > { %s1714_s12 = scalar_lea.hbm %s2235_s5, 512 }
  0x29   : > { %p1715_p2 = scmp.ne.s32.totalorder %s2235_s5, %s1714_s12  ;;  %p1721_p10 = scmp.lt.u32.totalorder %s1714_s12, %s2235_s5 }
  0x2b   : > { %p1717_p1 = pnand %p1715_p2, %p1688_p13 }
  0x2d   : > { %p1718_p6 = pneg %p1717_p1 }
  0x2f   : > { %p1723_p3 = pnand %p1721_p10, %p1718_p6 }
  0x31   : > { %1726 = shalt.err (!%p1723_p3)
}
  0x32   : > { %s1727_s7 = scalar_lea.vmem %s1943_s10, 512  ;;  %p1735_p12 = scmp.lt.s32.totalorder %s1943_s10, %s1943_s10 }
  0x33   : > { %p1728_p5 = scmp.ne.s32.totalorder %s1943_s10, %s1727_s7  ;;  %p1736_p0 = scmp.lt.s32.totalorder %s1727_s7, %s1727_s7 }
  0x35   : > { %p1730_p7 = pnand %p1728_p5, %p1688_p13  ;;  %p1737_p2 = por %p1736_p0, %p1735_p12 }
  0x37   : > { %p1731_p9 = pneg %p1730_p7 }
  0x39   : > { %p1738_p1 = pnand %p1737_p2, %p1731_p9 }
  0x3b   : > { %1741 = shalt.err (!%p1738_p1)
}
  0x3c   : > { %1632 = dma.hbm_to_vmem [thread:$0]  (!%p1939_p11), %s2235_s5, 512, %s1943_s10, [#allocation6], %s1846_s19, %s1846_s19, %s1847_s20  }
  0x3d   : > { %s1998_s26 = sadd.s32 1, %s1842_s24   ;;  %s30_s8 = sadd.s32 1, %s1838_s23 }
  0x3e   : > { %s27_s30 = ssub.s32 %s1842_s24, %s1998_s26  ;;  %p37_p13 = scmp.ne.s32.totalorder %s1838_s23, %s1834_s22 }
  0x3f   : > { %p28_p6 = scmp.eq.s32.totalorder %s27_s30, 0  ;;  %p38_p10 = scmp.eq.s32.totalorder %s1842_s24, 0 }
  0x40   : > { %p2244_p3 = scmp.eq.s32.totalorder %s1909_s25, 1  ;;  %p1643_p7 = scmp.lt.s32.totalorder %s1842_s24, 2 }
  0x41   : > { %s2014_s11 = scalar_select %p28_p6, %s1838_s23, %s30_s8  }
  0x42   : > { %p2008_p5 = por %p2244_p3, %p37_p13  ;;  %p39_p9 = por %p38_p10, %p37_p13 }
  0x43   : > { %s233_s12 = sand.u32 1, %s1838_s23   ;;  %s1356_s10 = sshll.u32 %s1842_s24, 7 }
  0x44   : > { %s2245_s9 = scalar_select %p2008_p5, 1, 0 }
  0x45   : > { %s1355_s13 = sshll.u32 %s233_s12, 3  ;;  %s2021_s14 = scalar_lea.hbm %s2230_s0, %s1356_s10 }
  0x46   : > { %s237_s15 = scalar_lea.vmem [#allocation2], %s1355_s13  ;;  %p2025_p11 = pnand %p1643_p7, %p39_p9 }
  0x47   : > { %s244_s16 = sshll.u32 %s237_s15, 4  ;;  %s234_s17 = scalar_lea.sflag [#allocation3], %s233_s12  ;;  %s2023_s16 = int_to_ptr.vmem [resolvable:$true] %s244_s16 }
  0x48   : > { %s1742_s18 = scalar_lea.hbm %s2021_s14, 128  ;;  %p1744_p0 = pneg %p2025_p11 }
  0x49   : > { %p1743_p12 = scmp.ne.s32.totalorder %s2021_s14, %s1742_s18  ;;  %s1747_s13 = scalar_lea.hbm %s2230_s0, 256 }
  0x4a   : > { %p1748_p13 = scmp.lt.u32.totalorder %s2021_s14, %s2230_s0  ;;  %p1749_p6 = scmp.lt.u32.totalorder %s1747_s13, %s1742_s18 }
  0x4b   : > { %p1745_p2 = pnand %p1744_p0, %p1743_p12  ;;  %p1751_p3 = scmp.lt.u32.totalorder %s1742_s18, %s2021_s14 }
  0x4c   : > { %p1750_p10 = por %p1749_p6, %p1748_p13 }
  0x4d   : > { %p1746_p1 = pneg %p1745_p2 }
  0x4e   : > { %p1752_p7 = por %p1751_p3, %p1750_p10 }
  0x50   : > { %p1753_p9 = pnand %p1752_p7, %p1746_p1 }
  0x52   : > { %1756 = shalt.err (!%p1753_p9)
}
  0x53   : > { %s1757_s12 = scalar_lea.vmem %s2023_s16, 128  ;;  %s1848_s20 = smov [#allocation2]  }
  0x54   : > { %p1758_p12 = scmp.ne.s32.totalorder %s2023_s16, %s1757_s12  ;;  %s1762_s15 = sshll.u32 %s1848_s20, 4  ;;  %s1763_s15 = int_to_ptr.vmem [resolvable:$false] %s1762_s15 }
  0x55   : > { %s1764_s8 = scalar_lea.vmem %s1763_s15, 256  ;;  %p1765_p4 = scmp.lt.s32.totalorder %s2023_s16, %s1763_s15 }
  0x56   : > { %p1760_p2 = pnand %p1758_p12, %p1744_p0  ;;  %p1766_p13 = scmp.lt.s32.totalorder %s1764_s8, %s1757_s12 }
  0x58   : > { %p1761_p5 = pneg %p1760_p2  ;;  %p1767_p6 = por %p1766_p13, %p1765_p4 }
  0x5a   : > { %p1768_p10 = pnand %p1767_p6, %p1761_p5 }
  0x5c   : > { %1771 = shalt.err (!%p1768_p10)
}
  0x5d   : > { %1636 = dma.hbm_to_vmem [thread:$0]  (!%p2025_p11), %s2021_s14, 128, %s2023_s16, %s234_s17  }
  0x5e   : > { %253 = sbr.rel (%p1928_p8) target bundleno = 2088 (0x828), region = 44  ;;  %s2057_s18 = sand.u32 (!%p1928_p8), 1, %s1834_s22  }
  0x5f   : > { %s1358_s30 = sshll.u32 (!%p1928_p8), %s2057_s18, 3  ;;  %s256_s13 = scalar_lea.sflag (!%p1928_p8), [#allocation3], %s2057_s18 }
  0x60   : > { %s259_s10 = scalar_lea.vmem (!%p1928_p8), [#allocation2], %s1358_s30  ;;  %p2247_p4 = scmp.ne.s32.totalorder (!%p1928_p8), %s2240_s27, 0 }
  0x65   : > { %1817 = dma.done.wait (%p2247_p4), %s256_s13, 128  }
  0x66   : > { %1819 = vsyncadd (%p2247_p4), %s256_s13, 4294967168  ;;  %p2248_p5 = scmp.eq.s32.totalorder %s1909_s25, 0 }
  0x68   : > { %1821 = dma.done.wait (%p2248_p5), [#allocation6], 2048   ;;  %p2249_p8 = pmov %p2248_p5 }
  0x69   : > { %v1849_v0 = vmov 0.0|0.0   ;;  %vm1850_vm0 = vmmov 0   ;;  %v1851_v1 = vmov 0.0   ;;  %v307_v2 = vld [vmem:[#allocation5] sm:$0xff]  ;;  %v308_v3 = vld [vmem:[#allocation5 + $0x8] sm:$0xff]  ;;  %v309_v4 = vld [vmem:[#allocation5 + $0x10] sm:$0xff] }
  0x6a   : > { %1823 = vsyncadd (%p2249_p8), [#allocation6], 4294965248  ;;  %1554 = vmatprep.subr.bf16.mxu0 %v1849_v0  ;;  %1448 = vmatprep.mubr.msk.f32.mxu0 %vm1850_vm0, %v1851_v1  ;;  %v1555_v5 = vpack.c.bf16 %v308_v3, %v307_v2  ;;  %v310_v6 = vld [vmem:[#allocation5 + $0x18] sm:$0xff]  ;;  %vm318_vm1 = vcmask 261120   ;;  %v2079_v9 = vld [vmem:[%s2233_s3] sm:$0xff]  ;;  %vm396_vm2 = vcmask 64512  }
  0x6b   : > { %v1558_v7 = vpack.c.bf16 %v310_v6, %v309_v4  ;;  %v306_v8 = vld [vmem:[%s259_s10] sm:$0xff]  ;;  %1453 = vmatprep.mubr.msk.f32.mxu1 %vm396_vm2, %v2079_v9  ;;  %v302_v15 = vld [vmem:[#allocation7] sm:$0xff]  ;;  %v303_v16 = vld [vmem:[#allocation7 + $0x8] sm:$0xff]  ;;  %s1383_s17 = sshll.u32 %s1909_s25, 7  ;;  %s295_s19 = scalar_lea.vmem [#allocation8], %s1358_s30 }
  0x6c   : > { %1556 = vmatpush3.bf16.msra.mxu0 %v1555_v5  ;;  %v1362_v10 = vld [vmem:[%s2232_s2] ss:$0 sm:$0xff]  ;;  %v2091_v19 = vld [vmem:[%s2233_s3 + $0x8] sm:$0xff]  ;;  %v2093_v20 = vpack.c.bf16 %v303_v16, %v302_v15  ;;  %v300_v27 = vld [vmem:[%s2234_s4 + $0x10] sm:$0xff]  ;;  %s1261_s12 = sshll.u32 %s295_s19, 4  ;;  %s2185_s8 = scalar_lea.hbm %s2236_s6, %s1383_s17  ;;  %s2187_s12 = int_to_ptr.vmem [resolvable:$true] %s1261_s12 }
  0x6d   : > { %1557 = vmatprep.subr.bf16.mxu0 %v1849_v0  ;;  %v304_v21 = vld [vmem:[#allocation7 + $0x10] sm:$0xff]  ;;  %v305_v22 = vld [vmem:[#allocation7 + $0x18] sm:$0xff]  ;;  %v301_v28 = vld [vmem:[%s2234_s4 + $0x18] sm:$0xff]  ;;  %s1248_s13 = scalar_lea.sflag [#allocation4], %s2057_s18  ;;  %s1772_s10 = scalar_lea.vmem %s2187_s12, 128 }
  0x6e   : > { %v2099_v23 = vpack.c.bf16 %v305_v22, %v304_v21  ;;  %v298_v24 = vld [vmem:[%s2234_s4] sm:$0xff]  ;;  %v299_v25 = vld [vmem:[%s2234_s4 + $0x8] sm:$0xff]  ;;  %v2122_v31 = vpack.c.bf16 %v301_v28, %v300_v27  ;;  %v625_v32 = vld [vmem:[#allocation5 + $0x20] sm:$0xff]  ;;  %p1773_p11 = scmp.ne.s32.totalorder %s2187_s12, %s1772_s10  ;;  %p2250_p0 = scmp.ne.s32.totalorder %s2245_s9, 0 }
  0x6f   : > { %v2112_v26 = vpack.c.bf16 %v299_v25, %v298_v24  ;;  %v626_v33 = vld [vmem:[#allocation5 + $0x28] sm:$0xff]  ;;  %v627_v35 = vld [vmem:[#allocation5 + $0x30] sm:$0xff]  ;;  %v628_v36 = vld [vmem:[#allocation5 + $0x38] sm:$0xff]  ;;  %s1852_s25 = smov [#allocation8]  }
  0x70   : > { %1559 = vmatpush3.bf16.msra.mxu0 %v1558_v7  ;;  %v1573_v34 = vpack.c.bf16 %v626_v33, %v625_v32  ;;  %v1576_v37 = vpack.c.bf16 %v628_v36, %v627_v35  ;;  %v1369_v40 = vld [vmem:[%s2232_s2 + $0x1] ss:$0 sm:$0xff]  ;;  %v936_v47 = vld [vmem:[#allocation5 + $0x40] sm:$0xff]  ;;  %v937_v48 = vld [vmem:[#allocation5 + $0x48] sm:$0xff]  ;;  %p1774_p1 = pnand %p1773_p11, %p2250_p0  ;;  %s1776_s30 = sshll.u32 %s1852_s25, 4  ;;  %s1777_s30 = int_to_ptr.vmem [resolvable:$false] %s1776_s30 }
  0x71   : > { %v938_v49 = vld [vmem:[#allocation5 + $0x50] sm:$0xff]  ;;  %v1591_v50 = vpack.c.bf16 %v937_v48, %v936_v47  ;;  %v939_v51 = vld [vmem:[#allocation5 + $0x58] sm:$0xff]  ;;  %s1778_s27 = scalar_lea.vmem %s1777_s30, 256  ;;  %p1779_p7 = scmp.lt.s32.totalorder %s2187_s12, %s1777_s30 }
  0x72   : > { %v1594_v52 = vpack.c.bf16 %v939_v51, %v938_v49  ;;  %v1376_v57 = vld [vmem:[%s2232_s2 + $0x2] ss:$0 sm:$0xff]  ;;  %p1775_p3 = pneg %p1774_p1  ;;  %p1780_p9 = scmp.lt.s32.totalorder %s1778_s27, %s1772_s10 }
  0x73   : > { %1449 = vmatmul.mubr.msk.f32.vlgmr.msra.gmra.mrb[0].mxu0 %vm318_vm1, %v306_v8 }
  0x74   : > { %1491 = vmatprep.mubr.msk.f32.mxu0 %vm396_vm2, %v2079_v9  ;;  %p1781_p12 = por %p1780_p9, %p1779_p7 }
  0x76   : > { %p1782_p2 = pnand %p1781_p12, %p1775_p3 }
 0x146   : > { %v388_v11 = vpop.f32.mrb[0].mxu0 }
 0x147   : > { %v389_v12 = vadd.f32 %v1362_v10, %v388_v11  ;;  %v1450_v13 = vpop.f32.mrb[1].mxu0 }
 0x149   : > { %v392_v14 = vadd.f32 %v389_v12, %v306_v8 }
 0x14b   : > { %vm393_vm3 = vcmp.ge.f32.partialorder %v392_v14, 0.0  ;;  %v394_v17 = vmul.f32 0.2, %v392_v14 }
 0x14d   : > { %v395_v18 = vsel %vm393_vm3, %v392_v14, %v394_v17 }
 0x14e   : > { %1451 = vmatprep.subr.mxu1 %v395_v18 }
 0x14f   : > { %1452 = vmatpush3.msra.mxu1 %v395_v18 }
 0x150   : > { %1454 = vmatmul.mubr.msk.f32.vlgmr.msra.gmra.mrb[0].mxu1 %vm396_vm2, %v2091_v19  ;;  %1560 = vmatprep.subr.bf16.mxu1 %v1849_v0 }
 0x151   : > { %1562 = vmatpush3.bf16.msra.mxu1 %v2093_v20  ;;  %1464 = vmatprep.mubr.msk.f32.mxu1 %vm1850_vm0, %v1851_v1 }
 0x152   : > { %1563 = vmatprep.subr.bf16.mxu1 %v1849_v0 }
 0x155   : > { %1565 = vmatpush3.bf16.msra.mxu1 %v2099_v23 }
 0x156   : > { %1566 = vmatprep.subr.bf16.mxu1 %v1849_v0 }
 0x223   : > { %v1455_v29 = vpop.f32.mrb[0].mxu1 }
 0x224   : > { %v469_v30 = vpop.f32.mrb[1].mxu1  ;;  %1465 = vmatmul.mubr.msk.f32.vlgmr.msra.gmra.mrb[2].mxu1 %vm318_vm1, %v1455_v29 }
 0x225   : > { %1568 = vmatpush3.bf16.msra.mxu1 %v2112_v26  ;;  %1475 = vmatprep.mubr.msk.f32.mxu1 %vm1850_vm0, %v1851_v1 }
 0x226   : > { %1569 = vmatprep.subr.bf16.mxu1 %v1849_v0 }
 0x229   : > { %1571 = vmatpush3.bf16.msra.mxu1 %v2122_v31 }
 0x22a   : > { %1572 = vmatprep.subr.bf16.mxu1 %v1849_v0 }
 0x22c   : > { %1476 = vmatmul.mubr.msk.f32.vlgmr.msra.gmra.mrb[2].mxu1 %vm318_vm1, %v469_v30 }
 0x22d   : > { %1574 = vmatpush3.bf16.msra.mxu1 %v1573_v34  ;;  %1486 = vmatprep.mubr.msk.f32.mxu1 %vm1850_vm0, %v1851_v1 }
 0x22e   : > { %1575 = vmatprep.subr.bf16.mxu1 %v1849_v0 }
 0x231   : > { %1577 = vmatpush3.bf16.msra.mxu1 %v1576_v37 }
 0x232   : > { %1578 = vmatprep.subr.bf16.mxu1 %v1849_v0 }
 0x2ff   : > { %v620_v38 = vpop.f32.mrb[2].mxu1 }
 0x300   : > { %v1477_v39 = vpop.f32.mrb[3].mxu1  ;;  %1487 = vmatmul.mubr.msk.f32.vlgmr.msra.gmra.mrb[4].mxu1 %vm318_vm1, %v620_v38 }
 0x301   : > { %1580 = vmatpush3.bf16.msra.mxu1 %v2093_v20  ;;  %1502 = vmatprep.mubr.msk.f32.mxu1 %vm1850_vm0, %v1851_v1 }
 0x302   : > { %1581 = vmatprep.subr.bf16.mxu1 %v1849_v0 }
 0x305   : > { %1583 = vmatpush3.bf16.msra.mxu1 %v2099_v23 }
 0x306   : > { %1584 = vmatprep.subr.bf16.mxu1 %v1849_v0 }
 0x3d3   : > { %v706_v41 = vpop.f32.mrb[4].mxu1 }
 0x3d4   : > { %v707_v42 = vadd.f32 %v1369_v40, %v706_v41  ;;  %v1488_v43 = vpop.f32.mrb[5].mxu1 }
 0x3d6   : > { %v710_v44 = vadd.f32 %v707_v42, %v620_v38 }
 0x3d8   : > { %vm711_vm4 = vcmp.ge.f32.partialorder %v710_v44, 0.0  ;;  %v712_v45 = vmul.f32 0.2, %v710_v44 }
 0x3da   : > { %v713_v46 = vsel %vm711_vm4, %v710_v44, %v712_v45 }
 0x3db   : > { %1489 = vmatprep.subr.mxu0 %v713_v46 }
 0x3dc   : > { %1490 = vmatpush3.msra.mxu0 %v713_v46 }
 0x3dd   : > { %1492 = vmatmul.mubr.msk.f32.vlgmr.msra.gmra.mrb[2].mxu0 %vm396_vm2, %v2091_v19  ;;  %1590 = vmatprep.subr.bf16.mxu0 %v1849_v0 }
 0x3de   : > { %1524 = vmatprep.mubr.msk.f32.mxu0 %vm1850_vm0, %v1851_v1  ;;  %1592 = vmatpush3.bf16.msra.mxu0 %v1591_v50 }
 0x3df   : > { %1593 = vmatprep.subr.bf16.mxu0 %v1849_v0 }
 0x3e2   : > { %1595 = vmatpush3.bf16.msra.mxu0 %v1594_v52 }
 0x4b0   : > { %v1493_v53 = vpop.f32.mrb[2].mxu0 }
 0x4b1   : > { %v780_v54 = vpop.f32.mrb[3].mxu0  ;;  %1503 = vmatmul.mubr.msk.f32.vlgmr.msra.gmra.mrb[6].mxu1 %vm318_vm1, %v1493_v53 }
 0x4b2   : > { %1586 = vmatpush3.bf16.msra.mxu1 %v2112_v26  ;;  %1513 = vmatprep.mubr.msk.f32.mxu1 %vm1850_vm0, %v1851_v1 }
 0x4b3   : > { %1587 = vmatprep.subr.bf16.mxu1 %v1849_v0 }
 0x4b6   : > { %1589 = vmatpush3.bf16.msra.mxu1 %v2122_v31 }
 0x4b9   : > { %1514 = vmatmul.mubr.msk.f32.vlgmr.msra.gmra.mrb[6].mxu1 %vm318_vm1, %v780_v54 }
 0x58c   : > { %v931_v55 = vpop.f32.mrb[6].mxu1 }
 0x58d   : > { %v1515_v56 = vpop.f32.mrb[7].mxu1  ;;  %1525 = vmatmul.mubr.msk.f32.vlgmr.msra.gmra.mrb[4].mxu0 %vm318_vm1, %v931_v55 }
 0x58e   : > { %1529 = vmatprep.mubr.msk.f32.mxu0 %vm396_vm2, %v2079_v9 }
 0x660   : > { %v1017_v58 = vpop.f32.mrb[4].mxu0 }
 0x661   : > { %v1018_v59 = vadd.f32 %v1376_v57, %v1017_v58  ;;  %v1526_v60 = vpop.f32.mrb[5].mxu0 }
 0x663   : > { %v1021_v61 = vadd.f32 %v1018_v59, %v931_v55 }
 0x665   : > { %vm1022_vm5 = vcmp.ge.f32.partialorder %v1021_v61, 0.0  ;;  %v1023_v62 = vmul.f32 0.2, %v1021_v61 }
 0x667   : > { %v1024_v63 = vsel %vm1022_vm5, %v1021_v61, %v1023_v62 }
 0x668   : > { %1527 = vmatprep.subr.mxu0 %v1024_v63 }
 0x669   : > { %1528 = vmatpush3.msra.mxu0 %v1024_v63 }
 0x66a   : > { %1530 = vmatmul.mubr.msk.f32.vlgmr.msra.gmra.mrb[6].mxu0 %vm396_vm2, %v2091_v19  ;;  %1596 = vmatprep.subr.bf16.mxu0 %v1849_v0 }
 0x66b   : > { %1598 = vmatpush3.bf16.msra.mxu0 %v2093_v20  ;;  %1540 = vmatprep.mubr.msk.f32.mxu0 %vm1850_vm0, %v1851_v1 }
 0x66c   : > { %1599 = vmatprep.subr.bf16.mxu0 %v1849_v0 }
 0x66f   : > { %1601 = vmatpush3.bf16.msra.mxu0 %v2099_v23 }
 0x670   : > { %1602 = vmatprep.subr.bf16.mxu0 %v1849_v0 }
 0x73d   : > { %v1531_v2 = vpop.f32.mrb[6].mxu0 }
 0x73e   : > { %1541 = vmatmul.mubr.msk.f32.vlgmr.msra.gmra.mrb[8].mxu0 %vm318_vm1, %v1531_v2  ;;  %v1091_v3 = vpop.f32.mrb[7].mxu0 }
 0x73f   : > { %1604 = vmatpush3.bf16.msra.mxu0 %v2112_v26  ;;  %1551 = vmatprep.mubr.msk.f32.mxu0 %vm1850_vm0, %v1851_v1 }
 0x740   : > { %1605 = vmatprep.subr.bf16.mxu0 %v1849_v0 }
 0x743   : > { %1607 = vmatpush3.bf16.msra.mxu0 %v2122_v31 }
 0x746   : > { %1552 = vmatmul.mubr.msk.f32.vlgmr.msra.gmra.mrb[8].mxu0 %vm318_vm1, %v1091_v3 }
 0x819   : > { %v1242_v1 = vpop.f32.mrb[8].mxu0 }
 0x81a   : > { %1246 = vst.msk [vmem:[%s295_s19] sm:$0xff] %vm318_vm1, %v1242_v1  ;;  %v1553_v0 = vpop.f32.mrb[9].mxu0 }
 0x81b   : > { %1785 = shalt.err (!%p1782_p2)
}
 0x81c   : > { %s1786_s18 = scalar_lea.hbm %s2185_s8, 128  ;;  %s1790_s16 = scalar_lea.hbm %s2236_s6, 256 }
 0x81d   : > { %p1787_p13 = scmp.ne.s32.totalorder %s2185_s8, %s1786_s18  ;;  %p1791_p4 = scmp.lt.u32.totalorder %s2185_s8, %s2236_s6 }
 0x81e   : > { %p1792_p5 = scmp.lt.u32.totalorder %s1790_s16, %s1786_s18  ;;  %p1794_p11 = scmp.lt.u32.totalorder %s1786_s18, %s2185_s8 }
 0x81f   : > { %p1788_p6 = pnand %p1787_p13, %p2250_p0 }
 0x820   : > { %p1793_p8 = por %p1792_p5, %p1791_p4 }
 0x821   : > { %p1789_p10 = pneg %p1788_p6 }
 0x822   : > { %p1795_p1 = por %p1794_p11, %p1793_p8 }
 0x824   : > { %p1796_p3 = pnand %p1795_p1, %p1789_p10 }
 0x826   : > { %1799 = shalt.err (!%p1796_p3)
}
 0x827   : > { %1624 = dma.vmem_to_hbm [thread:$0]  (%p2250_p0), %s2187_s12, 128, %s2185_s8, %s1248_s13  }
 0x828 PF: > { %s1273_s19 = sand.u32 1, %s1830_s21   ;;  %p2251_p7 = scmp.ne.s32.totalorder %s2241_s28, 0 }
 0x829   : > { %p2252_p9 = scmp.ge.s32.totalorder %s1842_s24, 2  ;;  %s1274_s20 = scalar_lea.sflag [#allocation4], %s1273_s19 }
 0x82b   : > { %p1638_p12 = pnand %p2252_p9, %p2251_p7 }
 0x82d   : > { %1825 = dma.done.wait (!%p1638_p12), %s1274_s20, 128  }
 0x82e   : > { %1827 = vsyncadd (!%p1638_p12), %s1274_s20, 4294967168  ;;  %p20_p2 = scmp.ge.s32.totalorder %s1998_s26, 4   ;;  %s2253_s21 = smov %s1834_s22 }
 0x82f   : > { %s2254_s22 = smov %s1838_s23  ;;  %s2255_s23 = smov %s2014_s11 }
 0x830   : > { %s2256_s24 = smov %s1998_s26  ;;  %22 = sbr.rel (!%p20_p2) target bundleno = 6 (0x6), region = 101 }
 0x837   :  { %1279 = vsyncpa [#allocation3], 1 }
 0x838   :  { %1281 = vsyncpa [#allocation3 + $0x1], 1 }
 0x839   :  { %1282 = vsyncpa [#allocation6], 1 }
 0x83a   :  { %1283 = vsyncpa [#allocation4], 1 }
 0x83b   :  { %1285 = vsyncpa [#allocation4 + $0x1], 1 }

// kernel: tpu_custom_call.1
= control target key start
LH: loop header
LB: loop body
LE: loop exit
PB: predicated region body
PF: predicated region fallthrough
CT: control target
= control target key end

     0   :  { %11 = vsyncpa [#allocation3], 0  ;;  %s2230_s0 = inlined_call_operand.hbm [shape: f32[2,8,32], index: 0, kind: input, shape index: {}]   ;;  %s2231_s1 = inlined_call_operand.hbm [shape: f32[3,32,32], index: 1, kind: input, shape index: {}]   ;;  %s2232_s2 = inlined_call_operand.vmem [shape: f32[3,1,32], index: 2, kind: input, shape index: {}]   ;;  %s2233_s3 = inlined_call_operand.vmem [shape: f32[16,8], index: 3, kind: input, shape index: {}]   ;;  %s2234_s4 = inlined_call_operand.vmem [shape: f32[32,32], index: 4, kind: input, shape index: {}]   ;;  %s2235_s5 = inlined_call_operand.hbm [shape: f32[32,32], index: 5, kind: input, shape index: {}]   ;;  %s2236_s6 = inlined_call_operand.hbm [shape: f32[2,8,32], index: 6, kind: output, shape index: {}]  }
   0x1   :  { %13 = vsyncpa [#allocation3 + $0x1], 0 }
   0x2   :  { %14 = vsyncpa [#allocation6], 0 }
   0x3   :  { %15 = vsyncpa [#allocation4], 0 }
   0x4   :  { %17 = vsyncpa [#allocation4 + $0x1], 0  ;;  %s1888_s21 = smov 0   ;;  %s1890_s22 = smov 0  }
   0x5   :  { %s1892_s23 = smov 0   ;;  %s1894_s24 = smov 0  }
   0x6 LB: > { %s1909_s25 = sadd.s32 4294967295, %s1842_s24   ;;  %s1350_s26 = sadd.s32 4294967294, %s1842_s24   ;;  %s1842_s24 = sphi %s1894_s24, %s2256_s24   ;;  %s1838_s23 = sphi %s1892_s23, %s2255_s23   ;;  %s1834_s22 = sphi %s1890_s22, %s2254_s22   ;;  %s1830_s21 = sphi %s1888_s21, %s2253_s21  }
   0x7   : > { %p43_p0 = scmp.ne.s32.totalorder %s1834_s22, %s1830_s21  ;;  %p2237_p1 = scmp.eq.s32.totalorder %s1909_s25, 0 }
   0x8   : > { %p178_p3 = scmp.eq.s32.totalorder %s1350_s26, 1  ;;  %p1351_p5 = scmp.ge.s32.totalorder %s1842_s24, 1 }
   0x9   : > { %p1918_p4 = por %p2237_p1, %p43_p0  ;;  %p185_p7 = scmp.lt.s32.totalorder %s1842_s24, 3 }
   0xa   : > { %p1923_p6 = por %p178_p3, %p43_p0  ;;  %s1844_s30 = smov [#allocation5]  }
   0xb   : > { %s2240_s27 = scalar_select %p1918_p4, 1, 0 }
   0xc   : > { %s2241_s28 = scalar_select %p1923_p6, 1, 0 }
   0xd   : > { %p1928_p8 = pnand %p1351_p5, %p185_p7  ;;  %s197_s7 = sshll.u32 %s1844_s30, 4  ;;  %s1932_s7 = int_to_ptr.vmem [resolvable:$true] %s197_s7 }
   0xe   : > { %s1845_s9 = smov [#allocation7]   ;;  %s1686_s13 = scalar_lea.hbm %s2231_s1, 1536 }
   0xf   : > { %p1626_p9 = pneg %p1928_p8  ;;  %s219_s10 = sshll.u32 %s1845_s9, 4  ;;  %s1943_s10 = int_to_ptr.vmem [resolvable:$true] %s219_s10 }
  0x10   : > { %p1687_p12 = scmp.ne.s32.totalorder %s2231_s1, %s1686_s13  ;;  %p1693_p5 = scmp.lt.u32.totalorder %s1686_s13, %s2231_s1 }
  0x11   : > { %p1939_p11 = pnand %p1626_p9, %p2237_p1 }
  0x13   : > { %p1688_p13 = pneg %p1939_p11 }
  0x15   : > { %p1689_p0 = pnand %p1688_p13, %p1687_p12 }
  0x17   : > { %p1690_p3 = pneg %p1689_p0 }
  0x19   : > { %p1695_p7 = pnand %p1693_p5, %p1690_p3 }
  0x1b   : > { %1698 = shalt.err (!%p1695_p7)
}
  0x1c   : > { %s1699_s18 = scalar_lea.vmem %s1932_s7, 1536  ;;  %p1707_p2 = scmp.lt.s32.totalorder %s1932_s7, %s1932_s7 }
  0x1d   : > { %p1700_p9 = scmp.ne.s32.totalorder %s1932_s7, %s1699_s18  ;;  %p1708_p12 = scmp.lt.s32.totalorder %s1699_s18, %s1699_s18 }
  0x1f   : > { %p1702_p10 = pnand %p1700_p9, %p1688_p13  ;;  %p1709_p0 = por %p1708_p12, %p1707_p2 }
  0x21   : > { %p1703_p1 = pneg %p1702_p10 }
  0x23   : > { %p1710_p6 = pnand %p1709_p0, %p1703_p1 }
  0x25   : > { %1713 = shalt.err (!%p1710_p6)
}
  0x26   : > { %s1846_s19 = smov 128   ;;  %s1847_s20 = smov 8  }
  0x27   : > { %1629 = dma.hbm_to_vmem [thread:$0]  (!%p1939_p11), %s2231_s1, 1536, %s1932_s7, [#allocation6], %s1846_s19, %s1846_s19, %s1847_s20  }
  0x28   : > { %s1714_s12 = scalar_lea.hbm %s2235_s5, 512 }
  0x29   : > { %p1715_p2 = scmp.ne.s32.totalorder %s2235_s5, %s1714_s12  ;;  %p1721_p10 = scmp.lt.u32.totalorder %s1714_s12, %s2235_s5 }
  0x2b   : > { %p1717_p1 = pnand %p1715_p2, %p1688_p13 }
  0x2d   : > { %p1718_p6 = pneg %p1717_p1 }
  0x2f   : > { %p1723_p3 = pnand %p1721_p10, %p1718_p6 }
  0x31   : > { %1726 = shalt.err (!%p1723_p3)
}
  0x32   : > { %s1727_s7 = scalar_lea.vmem %s1943_s10, 512  ;;  %p1735_p12 = scmp.lt.s32.totalorder %s1943_s10, %s1943_s10 }
  0x33   : > { %p1728_p5 = scmp.ne.s32.totalorder %s1943_s10, %s1727_s7  ;;  %p1736_p0 = scmp.lt.s32.totalorder %s1727_s7, %s1727_s7 }
  0x35   : > { %p1730_p7 = pnand %p1728_p5, %p1688_p13  ;;  %p1737_p2 = por %p1736_p0, %p1735_p12 }
  0x37   : > { %p1731_p9 = pneg %p1730_p7 }
  0x39   : > { %p1738_p1 = pnand %p1737_p2, %p1731_p9 }
  0x3b   : > { %1741 = shalt.err (!%p1738_p1)
}
  0x3c   : > { %1632 = dma.hbm_to_vmem [thread:$0]  (!%p1939_p11), %s2235_s5, 512, %s1943_s10, [#allocation6], %s1846_s19, %s1846_s19, %s1847_s20  }
  0x3d   : > { %s1998_s26 = sadd.s32 1, %s1842_s24   ;;  %s30_s8 = sadd.s32 1, %s1838_s23 }
  0x3e   : > { %s27_s30 = ssub.s32 %s1842_s24, %s1998_s26  ;;  %p37_p13 = scmp.ne.s32.totalorder %s1838_s23, %s1834_s22 }
  0x3f   : > { %p28_p6 = scmp.eq.s32.totalorder %s27_s30, 0  ;;  %p38_p10 = scmp.eq.s32.totalorder %s1842_s24, 0 }
  0x40   : > { %p2244_p3 = scmp.eq.s32.totalorder %s1909_s25, 1  ;;  %p1643_p7 = scmp.lt.s32.totalorder %s1842_s24, 2 }
  0x41   : > { %s2014_s11 = scalar_select %p28_p6, %s1838_s23, %s30_s8  }
  0x42   : > { %p2008_p5 = por %p2244_p3, %p37_p13  ;;  %p39_p9 = por %p38_p10, %p37_p13 }
  0x43   : > { %s233_s12 = sand.u32 1, %s1838_s23   ;;  %s1356_s10 = sshll.u32 %s1842_s24, 7 }
  0x44   : > { %s2245_s9 = scalar_select %p2008_p5, 1, 0 }
  0x45   : > { %s1355_s13 = sshll.u32 %s233_s12, 3  ;;  %s2021_s14 = scalar_lea.hbm %s2230_s0, %s1356_s10 }
  0x46   : > { %s237_s15 = scalar_lea.vmem [#allocation2], %s1355_s13  ;;  %p2025_p11 = pnand %p1643_p7, %p39_p9 }
  0x47   : > { %s244_s16 = sshll.u32 %s237_s15, 4  ;;  %s234_s17 = scalar_lea.sflag [#allocation3], %s233_s12  ;;  %s2023_s16 = int_to_ptr.vmem [resolvable:$true] %s244_s16 }
  0x48   : > { %s1742_s18 = scalar_lea.hbm %s2021_s14, 128  ;;  %p1744_p0 = pneg %p2025_p11 }
  0x49   : > { %p1743_p12 = scmp.ne.s32.totalorder %s2021_s14, %s1742_s18  ;;  %s1747_s13 = scalar_lea.hbm %s2230_s0, 256 }
  0x4a   : > { %p1748_p13 = scmp.lt.u32.totalorder %s2021_s14, %s2230_s0  ;;  %p1749_p6 = scmp.lt.u32.totalorder %s1747_s13, %s1742_s18 }
  0x4b   : > { %p1745_p2 = pnand %p1744_p0, %p1743_p12  ;;  %p1751_p3 = scmp.lt.u32.totalorder %s1742_s18, %s2021_s14 }
  0x4c   : > { %p1750_p10 = por %p1749_p6, %p1748_p13 }
  0x4d   : > { %p1746_p1 = pneg %p1745_p2 }
  0x4e   : > { %p1752_p7 = por %p1751_p3, %p1750_p10 }
  0x50   : > { %p1753_p9 = pnand %p1752_p7, %p1746_p1 }
  0x52   : > { %1756 = shalt.err (!%p1753_p9)
}
  0x53   : > { %s1757_s12 = scalar_lea.vmem %s2023_s16, 128  ;;  %s1848_s20 = smov [#allocation2]  }
  0x54   : > { %p1758_p12 = scmp.ne.s32.totalorder %s2023_s16, %s1757_s12  ;;  %s1762_s15 = sshll.u32 %s1848_s20, 4  ;;  %s1763_s15 = int_to_ptr.vmem [resolvable:$false] %s1762_s15 }
  0x55   : > { %s1764_s8 = scalar_lea.vmem %s1763_s15, 256  ;;  %p1765_p4 = scmp.lt.s32.totalorder %s2023_s16, %s1763_s15 }
  0x56   : > { %p1760_p2 = pnand %p1758_p12, %p1744_p0  ;;  %p1766_p13 = scmp.lt.s32.totalorder %s1764_s8, %s1757_s12 }
  0x58   : > { %p1761_p5 = pneg %p1760_p2  ;;  %p1767_p6 = por %p1766_p13, %p1765_p4 }
  0x5a   : > { %p1768_p10 = pnand %p1767_p6, %p1761_p5 }
  0x5c   : > { %1771 = shalt.err (!%p1768_p10)
}
  0x5d   : > { %1636 = dma.hbm_to_vmem [thread:$0]  (!%p2025_p11), %s2021_s14, 128, %s2023_s16, %s234_s17  }
  0x5e   : > { %253 = sbr.rel (%p1928_p8) target bundleno = 2088 (0x828), region = 44  ;;  %s2057_s18 = sand.u32 (!%p1928_p8), 1, %s1834_s22  }
  0x5f   : > { %s1358_s30 = sshll.u32 (!%p1928_p8), %s2057_s18, 3  ;;  %s256_s13 = scalar_lea.sflag (!%p1928_p8), [#allocation3], %s2057_s18 }
  0x60   : > { %s259_s10 = scalar_lea.vmem (!%p1928_p8), [#allocation2], %s1358_s30  ;;  %p2247_p4 = scmp.ne.s32.totalorder (!%p1928_p8), %s2240_s27, 0 }
  0x65   : > { %1817 = dma.done.wait (%p2247_p4), %s256_s13, 128  }
  0x66   : > { %1819 = vsyncadd (%p2247_p4), %s256_s13, 4294967168  ;;  %p2248_p5 = scmp.eq.s32.totalorder %s1909_s25, 0 }
  0x68   : > { %1821 = dma.done.wait (%p2248_p5), [#allocation6], 2048   ;;  %p2249_p8 = pmov %p2248_p5 }
  0x69   : > { %v1849_v0 = vmov 0.0|0.0   ;;  %vm1850_vm0 = vmmov 0   ;;  %v1851_v1 = vmov 0.0   ;;  %v307_v2 = vld [vmem:[#allocation5] sm:$0xff]  ;;  %v308_v3 = vld [vmem:[#allocation5 + $0x8] sm:$0xff]  ;;  %v309_v4 = vld [vmem:[#allocation5 + $0x10] sm:$0xff] }
  0x6a   : > { %1823 = vsyncadd (%p2249_p8), [#allocation6], 4294965248  ;;  %1554 = vmatprep.subr.bf16.mxu0 %v1849_v0  ;;  %1448 = vmatprep.mubr.msk.f32.mxu0 %vm1850_vm0, %v1851_v1  ;;  %v1555_v5 = vpack.c.bf16 %v308_v3, %v307_v2  ;;  %v310_v6 = vld [vmem:[#allocation5 + $0x18] sm:$0xff]  ;;  %vm318_vm1 = vcmask 261120   ;;  %v2079_v9 = vld [vmem:[%s2233_s3] sm:$0xff]  ;;  %vm396_vm2 = vcmask 64512  }
  0x6b   : > { %v1558_v7 = vpack.c.bf16 %v310_v6, %v309_v4  ;;  %v306_v8 = vld [vmem:[%s259_s10] sm:$0xff]  ;;  %1453 = vmatprep.mubr.msk.f32.mxu1 %vm396_vm2, %v2079_v9  ;;  %v302_v15 = vld [vmem:[#allocation7] sm:$0xff]  ;;  %v303_v16 = vld [vmem:[#allocation7 + $0x8] sm:$0xff]  ;;  %s1383_s17 = sshll.u32 %s1909_s25, 7  ;;  %s295_s19 = scalar_lea.vmem [#allocation8], %s1358_s30 }
  0x6c   : > { %1556 = vmatpush3.bf16.msra.mxu0 %v1555_v5  ;;  %v1362_v10 = vld [vmem:[%s2232_s2] ss:$0 sm:$0xff]  ;;  %v2091_v19 = vld [vmem:[%s2233_s3 + $0x8] sm:$0xff]  ;;  %v2093_v20 = vpack.c.bf16 %v303_v16, %v302_v15  ;;  %v300_v27 = vld [vmem:[%s2234_s4 + $0x10] sm:$0xff]  ;;  %s1261_s12 = sshll.u32 %s295_s19, 4  ;;  %s2185_s8 = scalar_lea.hbm %s2236_s6, %s1383_s17  ;;  %s2187_s12 = int_to_ptr.vmem [resolvable:$true] %s1261_s12 }
  0x6d   : > { %1557 = vmatprep.subr.bf16.mxu0 %v1849_v0  ;;  %v304_v21 = vld [vmem:[#allocation7 + $0x10] sm:$0xff]  ;;  %v305_v22 = vld [vmem:[#allocation7 + $0x18] sm:$0xff]  ;;  %v301_v28 = vld [vmem:[%s2234_s4 + $0x18] sm:$0xff]  ;;  %s1248_s13 = scalar_lea.sflag [#allocation4], %s2057_s18  ;;  %s1772_s10 = scalar_lea.vmem %s2187_s12, 128 }
  0x6e   : > { %v2099_v23 = vpack.c.bf16 %v305_v22, %v304_v21  ;;  %v298_v24 = vld [vmem:[%s2234_s4] sm:$0xff]  ;;  %v299_v25 = vld [vmem:[%s2234_s4 + $0x8] sm:$0xff]  ;;  %v2122_v31 = vpack.c.bf16 %v301_v28, %v300_v27  ;;  %v625_v32 = vld [vmem:[#allocation5 + $0x20] sm:$0xff]  ;;  %p1773_p11 = scmp.ne.s32.totalorder %s2187_s12, %s1772_s10  ;;  %p2250_p0 = scmp.ne.s32.totalorder %s2245_s9, 0 }
  0x6f   : > { %v2112_v26 = vpack.c.bf16 %v299_v25, %v298_v24  ;;  %v626_v33 = vld [vmem:[#allocation5 + $0x28] sm:$0xff]  ;;  %v627_v35 = vld [vmem:[#allocation5 + $0x30] sm:$0xff]  ;;  %v628_v36 = vld [vmem:[#allocation5 + $0x38] sm:$0xff]  ;;  %s1852_s25 = smov [#allocation8]  }
  0x70   : > { %1559 = vmatpush3.bf16.msra.mxu0 %v1558_v7  ;;  %v1573_v34 = vpack.c.bf16 %v626_v33, %v625_v32  ;;  %v1576_v37 = vpack.c.bf16 %v628_v36, %v627_v35  ;;  %v1369_v40 = vld [vmem:[%s2232_s2 + $0x1] ss:$0 sm:$0xff]  ;;  %v936_v47 = vld [vmem:[#allocation5 + $0x40] sm:$0xff]  ;;  %v937_v48 = vld [vmem:[#allocation5 + $0x48] sm:$0xff]  ;;  %p1774_p1 = pnand %p1773_p11, %p2250_p0  ;;  %s1776_s30 = sshll.u32 %s1852_s25, 4  ;;  %s1777_s30 = int_to_ptr.vmem [resolvable:$false] %s1776_s30 }
  0x71   : > { %v938_v49 = vld [vmem:[#allocation5 + $0x50] sm:$0xff]  ;;  %v1591_v50 = vpack.c.bf16 %v937_v48, %v936_v47  ;;  %v939_v51 = vld [vmem:[#allocation5 + $0x58] sm:$0xff]  ;;  %s1778_s27 = scalar_lea.vmem %s1777_s30, 256  ;;  %p1779_p7 = scmp.lt.s32.totalorder %s2187_s12, %s1777_s30 }
  0x72   : > { %v1594_v52 = vpack.c.bf16 %v939_v51, %v938_v49  ;;  %v1376_v57 = vld [vmem:[%s2232_s2 + $0x2] ss:$0 sm:$0xff]  ;;  %p1775_p3 = pneg %p1774_p1  ;;  %p1780_p9 = scmp.lt.s32.totalorder %s1778_s27, %s1772_s10 }
  0x73   : > { %1449 = vmatmul.mubr.msk.f32.vlgmr.msra.gmra.mrb[0].mxu0 %vm318_vm1, %v306_v8 }
  0x74   : > { %1491 = vmatprep.mubr.msk.f32.mxu0 %vm396_vm2, %v2079_v9  ;;  %p1781_p12 = por %p1780_p9, %p1779_p7 }
  0x76   : > { %p1782_p2 = pnand %p1781_p12, %p1775_p3 }
 0x146   : > { %v388_v11 = vpop.f32.mrb[0].mxu0 }
 0x147   : > { %v389_v12 = vadd.f32 %v1362_v10, %v388_v11  ;;  %v1450_v13 = vpop.f32.mrb[1].mxu0 }
 0x149   : > { %v392_v14 = vadd.f32 %v389_v12, %v306_v8 }
 0x14b   : > { %vm393_vm3 = vcmp.ge.f32.partialorder %v392_v14, 0.0  ;;  %v394_v17 = vmul.f32 0.2, %v392_v14 }
 0x14d   : > { %v395_v18 = vsel %vm393_vm3, %v392_v14, %v394_v17 }
 0x14e   : > { %1451 = vmatprep.subr.mxu1 %v395_v18 }
 0x14f   : > { %1452 = vmatpush3.msra.mxu1 %v395_v18 }
 0x150   : > { %1454 = vmatmul.mubr.msk.f32.vlgmr.msra.gmra.mrb[0].mxu1 %vm396_vm2, %v2091_v19  ;;  %1560 = vmatprep.subr.bf16.mxu1 %v1849_v0 }
 0x151   : > { %1562 = vmatpush3.bf16.msra.mxu1 %v2093_v20  ;;  %1464 = vmatprep.mubr.msk.f32.mxu1 %vm1850_vm0, %v1851_v1 }
 0x152   : > { %1563 = vmatprep.subr.bf16.mxu1 %v1849_v0 }
 0x155   : > { %1565 = vmatpush3.bf16.msra.mxu1 %v2099_v23 }
 0x156   : > { %1566 = vmatprep.subr.bf16.mxu1 %v1849_v0 }
 0x223   : > { %v1455_v29 = vpop.f32.mrb[0].mxu1 }
 0x224   : > { %v469_v30 = vpop.f32.mrb[1].mxu1  ;;  %1465 = vmatmul.mubr.msk.f32.vlgmr.msra.gmra.mrb[2].mxu1 %vm318_vm1, %v1455_v29 }
 0x225   : > { %1568 = vmatpush3.bf16.msra.mxu1 %v2112_v26  ;;  %1475 = vmatprep.mubr.msk.f32.mxu1 %vm1850_vm0, %v1851_v1 }
 0x226   : > { %1569 = vmatprep.subr.bf16.mxu1 %v1849_v0 }
 0x229   : > { %1571 = vmatpush3.bf16.msra.mxu1 %v2122_v31 }
 0x22a   : > { %1572 = vmatprep.subr.bf16.mxu1 %v1849_v0 }
 0x22c   : > { %1476 = vmatmul.mubr.msk.f32.vlgmr.msra.gmra.mrb[2].mxu1 %vm318_vm1, %v469_v30 }
 0x22d   : > { %1574 = vmatpush3.bf16.msra.mxu1 %v1573_v34  ;;  %1486 = vmatprep.mubr.msk.f32.mxu1 %vm1850_vm0, %v1851_v1 }
 0x22e   : > { %1575 = vmatprep.subr.bf16.mxu1 %v1849_v0 }
 0x231   : > { %1577 = vmatpush3.bf16.msra.mxu1 %v1576_v37 }
 0x232   : > { %1578 = vmatprep.subr.bf16.mxu1 %v1849_v0 }
 0x2ff   : > { %v620_v38 = vpop.f32.mrb[2].mxu1 }
 0x300   : > { %v1477_v39 = vpop.f32.mrb[3].mxu1  ;;  %1487 = vmatmul.mubr.msk.f32.vlgmr.msra.gmra.mrb[4].mxu1 %vm318_vm1, %v620_v38 }
 0x301   : > { %1580 = vmatpush3.bf16.msra.mxu1 %v2093_v20  ;;  %1502 = vmatprep.mubr.msk.f32.mxu1 %vm1850_vm0, %v1851_v1 }
 0x302   : > { %1581 = vmatprep.subr.bf16.mxu1 %v1849_v0 }
 0x305   : > { %1583 = vmatpush3.bf16.msra.mxu1 %v2099_v23 }
 0x306   : > { %1584 = vmatprep.subr.bf16.mxu1 %v1849_v0 }
 0x3d3   : > { %v706_v41 = vpop.f32.mrb[4].mxu1 }
 0x3d4   : > { %v707_v42 = vadd.f32 %v1369_v40, %v706_v41  ;;  %v1488_v43 = vpop.f32.mrb[5].mxu1 }
 0x3d6   : > { %v710_v44 = vadd.f32 %v707_v42, %v620_v38 }
 0x3d8   : > { %vm711_vm4 = vcmp.ge.f32.partialorder %v710_v44, 0.0  ;;  %v712_v45 = vmul.f32 0.2, %v710_v44 }
 0x3da   : > { %v713_v46 = vsel %vm711_vm4, %v710_v44, %v712_v45 }
 0x3db   : > { %1489 = vmatprep.subr.mxu0 %v713_v46 }
 0x3dc   : > { %1490 = vmatpush3.msra.mxu0 %v713_v46 }
 0x3dd   : > { %1492 = vmatmul.mubr.msk.f32.vlgmr.msra.gmra.mrb[2].mxu0 %vm396_vm2, %v2091_v19  ;;  %1590 = vmatprep.subr.bf16.mxu0 %v1849_v0 }
 0x3de   : > { %1524 = vmatprep.mubr.msk.f32.mxu0 %vm1850_vm0, %v1851_v1  ;;  %1592 = vmatpush3.bf16.msra.mxu0 %v1591_v50 }
 0x3df   : > { %1593 = vmatprep.subr.bf16.mxu0 %v1849_v0 }
 0x3e2   : > { %1595 = vmatpush3.bf16.msra.mxu0 %v1594_v52 }
 0x4b0   : > { %v1493_v53 = vpop.f32.mrb[2].mxu0 }
 0x4b1   : > { %v780_v54 = vpop.f32.mrb[3].mxu0  ;;  %1503 = vmatmul.mubr.msk.f32.vlgmr.msra.gmra.mrb[6].mxu1 %vm318_vm1, %v1493_v53 }
 0x4b2   : > { %1586 = vmatpush3.bf16.msra.mxu1 %v2112_v26  ;;  %1513 = vmatprep.mubr.msk.f32.mxu1 %vm1850_vm0, %v1851_v1 }
 0x4b3   : > { %1587 = vmatprep.subr.bf16.mxu1 %v1849_v0 }
 0x4b6   : > { %1589 = vmatpush3.bf16.msra.mxu1 %v2122_v31 }
 0x4b9   : > { %1514 = vmatmul.mubr.msk.f32.vlgmr.msra.gmra.mrb[6].mxu1 %vm318_vm1, %v780_v54 }
 0x58c   : > { %v931_v55 = vpop.f32.mrb[6].mxu1 }
 0x58d   : > { %v1515_v56 = vpop.f32.mrb[7].mxu1  ;;  %1525 = vmatmul.mubr.msk.f32.vlgmr.msra.gmra.mrb[4].mxu0 %vm318_vm1, %v931_v55 }
 0x58e   : > { %1529 = vmatprep.mubr.msk.f32.mxu0 %vm396_vm2, %v2079_v9 }
 0x660   : > { %v1017_v58 = vpop.f32.mrb[4].mxu0 }
 0x661   : > { %v1018_v59 = vadd.f32 %v1376_v57, %v1017_v58  ;;  %v1526_v60 = vpop.f32.mrb[5].mxu0 }
 0x663   : > { %v1021_v61 = vadd.f32 %v1018_v59, %v931_v55 }
 0x665   : > { %vm1022_vm5 = vcmp.ge.f32.partialorder %v1021_v61, 0.0  ;;  %v1023_v62 = vmul.f32 0.2, %v1021_v61 }
 0x667   : > { %v1024_v63 = vsel %vm1022_vm5, %v1021_v61, %v1023_v62 }
 0x668   : > { %1527 = vmatprep.subr.mxu0 %v1024_v63 }
 0x669   : > { %1528 = vmatpush3.msra.mxu0 %v1024_v63 }
 0x66a   : > { %1530 = vmatmul.mubr.msk.f32.vlgmr.msra.gmra.mrb[6].mxu0 %vm396_vm2, %v2091_v19  ;;  %1596 = vmatprep.subr.bf16.mxu0 %v1849_v0 }
 0x66b   : > { %1598 = vmatpush3.bf16.msra.mxu0 %v2093_v20  ;;  %1540 = vmatprep.mubr.msk.f32.mxu0 %vm1850_vm0, %v1851_v1 }
 0x66c   : > { %1599 = vmatprep.subr.bf16.mxu0 %v1849_v0 }
 0x66f   : > { %1601 = vmatpush3.bf16.msra.mxu0 %v2099_v23 }
 0x670   : > { %1602 = vmatprep.subr.bf16.mxu0 %v1849_v0 }
 0x73d   : > { %v1531_v2 = vpop.f32.mrb[6].mxu0 }
 0x73e   : > { %1541 = vmatmul.mubr.msk.f32.vlgmr.msra.gmra.mrb[8].mxu0 %vm318_vm1, %v1531_v2  ;;  %v1091_v3 = vpop.f32.mrb[7].mxu0 }
 0x73f   : > { %1604 = vmatpush3.bf16.msra.mxu0 %v2112_v26  ;;  %1551 = vmatprep.mubr.msk.f32.mxu0 %vm1850_vm0, %v1851_v1 }
 0x740   : > { %1605 = vmatprep.subr.bf16.mxu0 %v1849_v0 }
 0x743   : > { %1607 = vmatpush3.bf16.msra.mxu0 %v2122_v31 }
 0x746   : > { %1552 = vmatmul.mubr.msk.f32.vlgmr.msra.gmra.mrb[8].mxu0 %vm318_vm1, %v1091_v3 }
 0x819   : > { %v1242_v1 = vpop.f32.mrb[8].mxu0 }
 0x81a   : > { %1246 = vst.msk [vmem:[%s295_s19] sm:$0xff] %vm318_vm1, %v1242_v1  ;;  %v1553_v0 = vpop.f32.mrb[9].mxu0 }
 0x81b   : > { %1785 = shalt.err (!%p1782_p2)
}
 0x81c   : > { %s1786_s18 = scalar_lea.hbm %s2185_s8, 128  ;;  %s1790_s16 = scalar_lea.hbm %s2236_s6, 256 }
 0x81d   : > { %p1787_p13 = scmp.ne.s32.totalorder %s2185_s8, %s1786_s18  ;;  %p1791_p4 = scmp.lt.u32.totalorder %s2185_s8, %s2236_s6 }
 0x81e   : > { %p1792_p5 = scmp.lt.u32.totalorder %s1790_s16, %s1786_s18  ;;  %p1794_p11 = scmp.lt.u32.totalorder %s1786_s18, %s2185_s8 }
 0x81f   : > { %p1788_p6 = pnand %p1787_p13, %p2250_p0 }
 0x820   : > { %p1793_p8 = por %p1792_p5, %p1791_p4 }
 0x821   : > { %p1789_p10 = pneg %p1788_p6 }
 0x822   : > { %p1795_p1 = por %p1794_p11, %p1793_p8 }
 0x824   : > { %p1796_p3 = pnand %p1795_p1, %p1789_p10 }
 0x826   : > { %1799 = shalt.err (!%p1796_p3)
}
 0x827   : > { %1624 = dma.vmem_to_hbm [thread:$0]  (%p2250_p0), %s2187_s12, 128, %s2185_s8, %s1248_s13  }
 0x828 PF: > { %s1273_s19 = sand.u32 1, %s1830_s21   ;;  %p2251_p7 = scmp.ne.s32.totalorder %s2241_s28, 0 }
 0x829   : > { %p2252_p9 = scmp.ge.s32.totalorder %s1842_s24, 2  ;;  %s1274_s20 = scalar_lea.sflag [#allocation4], %s1273_s19 }
 0x82b   : > { %p1638_p12 = pnand %p2252_p9, %p2251_p7 }
 0x82d   : > { %1825 = dma.done.wait (!%p1638_p12), %s1274_s20, 128  }
 0x82e   : > { %1827 = vsyncadd (!%p1638_p12), %s1274_s20, 4294967168  ;;  %p20_p2 = scmp.ge.s32.totalorder %s1998_s26, 4   ;;  %s2253_s21 = smov %s1834_s22 }
 0x82f   : > { %s2254_s22 = smov %s1838_s23  ;;  %s2255_s23 = smov %s2014_s11 }
 0x830   : > { %s2256_s24 = smov %s1998_s26  ;;  %22 = sbr.rel (!%p20_p2) target bundleno = 6 (0x6), region = 101 }
 0x837   :  { %1279 = vsyncpa [#allocation3], 1 }
 0x838   :  { %1281 = vsyncpa [#allocation3 + $0x1], 1 }
 0x839   :  { %1282 = vsyncpa [#allocation6], 1 }
 0x83a   :  { %1283 = vsyncpa [#allocation4], 1 }
 0x83b   :  { %1285 = vsyncpa [#allocation4 + $0x1], 1 }

</bundles_post_ra>
